<compile_context>
chip_gen: v5e
topology: v5e:2x2
jax: 0.10.0
libtpu: 0.0.40
codegen_flags: <defaults>
</compile_context>

<pallas_src>
import functools

import jax
import jax.numpy as jnp
from jax.experimental import pallas as pl
from jax.experimental.pallas import tpu as pltpu

_LANE = 128          # channel padding granularity (vreg lane width)
_WIDTH_ALIGN = 16    # padded-width granularity (bf16 sublane tile)


def _round_up(x, m):
    return (x + m - 1) // m * m


def _vmem_limit_bytes():
    """Generation-aware VMEM limit: ~75% of physical, capped at 100 MiB."""
    try:
        cap = int(pltpu.get_tpu_info().vmem_capacity_bytes)
    except Exception:
        cap = 64 * 1024 * 1024          # conservative (v7x-sized) fallback
    return min(cap * 3 // 4, 100 * 1024 * 1024)


def _compiler_params(vmem_limit):
    return pltpu.CompilerParams(
        dimension_semantics=("parallel", "parallel"),
        vmem_limit_bytes=int(vmem_limit),
    )


def _pick_row_tile(hp, bytes_per_row, n_batch, budget_bytes):
    """Largest even divisor of the pooled height `hp` whose per-step working set fits
    the VMEM budget.  With a single image, keep >= 2 row steps for pipelining."""
    limit = max(2, budget_bytes // max(bytes_per_row, 1))
    if n_batch == 1:
        limit = min(limit, max(2, hp // 2))
    best = 2
    for t in range(2, min(limit, hp) + 1, 2):
        if hp % t == 0:
            best = t
    return best


# ----------------------- shared 3x3-conv tile contraction (im2col) ----------------------

def _conv_tile_matmul(xbuf, w_ref, *, t, wq):
    """xbuf: ((t+3)*wq, ci) bf16 scratch: t+2 valid conv-input rows + 1 zero row,
    spatially flattened (wq % 16 == 0 so the row axis is sublane aligned).
    Returns f32 (t*wq, co): one deep MXU contraction (K = 9*ci) over 9 row-shifted
    views; the two dx shifts are materialized once and reused across the 3 dy taps."""
    m = t * wq
    xf0 = xbuf[...]
    xf1 = xf0[1:]                         # dx = +1 shift (one relayout copy)
    xf2 = xf0[2:]                         # dx = +2 shift (one relayout copy)
    shifted = (xf0, xf1, xf2)
    taps = [shifted[dx][dy * wq: dy * wq + m] for dy in range(3) for dx in range(3)]
    patches = jnp.concatenate(taps, axis=1)                       # (m, 9*ci)
    return jnp.dot(patches, w_ref[...], preferred_element_type=jnp.float32)


def _pool2x2_flat(x, wq, ci):
    """(2r, wq, 2*ci) -> (r*wq, ci): horizontal pool over the lane-packed column pair,
    vertical pool over adjacent rows, then a layout-trivial spatial flatten."""
    h = jnp.maximum(x[:, :, :ci], x[:, :, ci:])
    h = h.reshape(x.shape[0] // 2, 2, wq, ci)
    return jnp.max(h, axis=1).reshape(-1, ci)


# ------------------- kernel 1: fused maxpool2x2 + conv3x3 + BN + ReLU -------------------

def _pool_conv_kernel(xm_ref, xh_ref, w_ref, shift_ref, o_ref, xbuf, *, th, wq, wp, ci):
    """One row tile of one image.
    xm_ref: (1, 2*th, wq, 2*ci) unpooled main rows (column pairs packed into lanes).
    xh_ref: (1, 4, wq, 2*ci)    next 4 unpooled rows (halo below; wrapper row-pad gives
                                real zeros at the image bottom).
    Output columns land directly in conv2's padded layout (valid data at cols 1..wp)."""
    m = th * wq
    xbuf[0:m] = _pool2x2_flat(xm_ref[0], wq, ci)                  # pooled main rows
    xbuf[m:m + 2 * wq] = _pool2x2_flat(xh_ref[0], wq, ci)         # pooled halo rows
    xbuf[m + 2 * wq:m + 3 * wq] = jnp.zeros((wq, ci), xbuf.dtype)  # trailing zero row

    y = _conv_tile_matmul(xbuf, w_ref, t=th, wq=wq)               # (m, co) f32
    y = jnp.maximum(y + shift_ref[...], 0.0)                      # folded BN shift + ReLU
    y = y.reshape(th, wq, -1)
    # Zero everything outside cols [1, wp] (junk / wrap-around columns) so this tensor
    # can be consumed by conv2 as an already-padded input.  Full-width dense store.
    col = jax.lax.broadcasted_iota(jnp.int32, (1, wq, 1), 1)
    y = jnp.where(jnp.logical_and(col >= 1, col <= wp), y, 0.0)
    o_ref[0] = y.astype(o_ref.dtype)


# --------------------------- kernel 2: conv3x3 + BN + ReLU ------------------------------

def _conv_kernel(xm_ref, xt_ref, xb_ref, w_ref, shift_ref, o_ref, xbuf, *, th, wq):
    """Input already column-padded by conv1; the 1-row vertical halo comes from clamped
    halo BlockSpecs and is zeroed at the image top/bottom via pl.when."""
    ci = xbuf.shape[-1]
    i = pl.program_id(1)
    m = th * wq
    zrow = jnp.zeros((wq, ci), xbuf.dtype)

    xbuf[0:wq] = xt_ref[0, 0]                                     # top halo row

    @pl.when(i == 0)
    def _():
        xbuf[0:wq] = zrow                                         # SAME pad at image top

    xbuf[wq:wq + m] = xm_ref[0].reshape(m, ci)                    # main rows
    xbuf[wq + m:2 * wq + m] = xb_ref[0, 0]                        # bottom halo row

    @pl.when(i == pl.num_programs(1) - 1)
    def _():
        xbuf[wq + m:2 * wq + m] = zrow                            # SAME pad at image bottom

    xbuf[2 * wq + m:3 * wq + m] = zrow                            # trailing zero row

    y = _conv_tile_matmul(xbuf, w_ref, t=th, wq=wq)
    y = jnp.maximum(y + shift_ref[...], 0.0)
    o_ref[0] = y.reshape(th, wq, -1).astype(o_ref.dtype)          # junk cols sliced in wrapper


# ---------------------------------- pallas_call wrappers --------------------------------

def _pool_conv_bn_relu(x_packed, w_flat, shift, *, hp, wp, wq, ci_p, co_p, vmem_limit):
    """x_packed: (N, H + 4, wq, 2*ci_p) bf16, spatially pre-padded, column pairs in lanes."""
    n = x_packed.shape[0]
    fixed = 2 * w_flat.size * 2 + 2 * 4 * wq * 2 * ci_p * 2 + (1 << 16)
    per_row = wq * (52 * ci_p + 14 * co_p)       # in blocks, scratch, shifts, patches, out
    budget = max(2 * per_row, int(vmem_limit * 0.6) - fixed)
    th = _pick_row_tile(hp, per_row, n, budget)
    kernel = functools.partial(_pool_conv_kernel, th=th, wq=wq, wp=wp, ci=ci_p)
    return pl.pallas_call(
        kernel,
        out_shape=jax.ShapeDtypeStruct((n, hp, wq, co_p), jnp.bfloat16),
        grid=(n, hp // th),
        in_specs=[
            # main rows: unpooled padded rows [2*th*i, 2*th*i + 2*th)
            pl.BlockSpec((1, 2 * th, wq, 2 * ci_p), lambda b, i: (b, i, 0, 0)),
            # halo: the next 4 unpooled rows
            pl.BlockSpec((1, 4, wq, 2 * ci_p),
                         lambda b, i: (b, (i + 1) * (th // 2), 0, 0)),
            pl.BlockSpec(w_flat.shape, lambda b, i: (0, 0)),      # resident weight
            pl.BlockSpec(shift.shape, lambda b, i: (0, 0)),
        ],
        out_specs=pl.BlockSpec((1, th, wq, co_p), lambda b, i: (b, i, 0, 0)),
        scratch_shapes=[pltpu.VMEM(((th + 3) * wq, ci_p), jnp.bfloat16)],
        compiler_params=_compiler_params(vmem_limit),
    )(x_packed, x_packed, w_flat, shift)


def _conv_bn_relu(x_lay, w_flat, shift, *, hp, wp, wq, ci_p, co_p, vmem_limit):
    """x_lay: (N, hp, wq, ci_p) bf16, already column-padded (col 0 zero, 1..wp data)."""
    n = x_lay.shape[0]
    fixed = 2 * w_flat.size * 2 + (1 << 16)
    per_row = wq * (32 * ci_p + 10 * co_p)
    budget = max(2 * per_row, int(vmem_limit * 0.6) - fixed)
    th = _pick_row_tile(hp, per_row, n, budget)
    kernel = functools.partial(_conv_kernel, th=th, wq=wq)
    return pl.pallas_call(
        kernel,
        out_shape=jax.ShapeDtypeStruct((n, hp, wq, co_p), jnp.bfloat16),
        grid=(n, hp // th),
        in_specs=[
            pl.BlockSpec((1, th, wq, ci_p), lambda b, i: (b, i, 0, 0)),
            # 1-row top/bottom halos, clamped at the image edges (zeroed in-kernel there)
            pl.BlockSpec((1, 1, wq, ci_p),
                         lambda b, i: (b, jnp.maximum(i * th - 1, 0), 0, 0)),
            pl.BlockSpec((1, 1, wq, ci_p),
                         lambda b, i: (b, jnp.minimum((i + 1) * th, hp - 1), 0, 0)),
            pl.BlockSpec(w_flat.shape, lambda b, i: (0, 0)),
            pl.BlockSpec(shift.shape, lambda b, i: (0, 0)),
        ],
        out_specs=pl.BlockSpec((1, th, wq, co_p), lambda b, i: (b, i, 0, 0)),
        scratch_shapes=[pltpu.VMEM(((th + 3) * wq, ci_p), jnp.bfloat16)],
        compiler_params=_compiler_params(vmem_limit),
    )(x_lay, x_lay, x_lay, w_flat, shift)


# ----------------------------------- parameter folding ----------------------------------

def _fold_bn(w_hwio, gamma, beta, mean, var, ci_p, co_p, eps=1e-5):
    """Zero-pad channels to 128-lane multiples, fold the BN (eval) scale into the conv
    weight along the output-channel axis, flatten for the im2col contraction, and keep
    only a per-channel additive shift for the kernel."""
    kh, kw, ci, co = w_hwio.shape
    inv = gamma / jnp.sqrt(var + eps)                                   # (co,)
    w = w_hwio.astype(jnp.float32) * inv[None, None, None, :]
    wpad = jnp.zeros((kh, kw, ci_p, co_p), jnp.float32).at[:, :, :ci, :co].set(w)
    w_flat = wpad.reshape(kh * kw * ci_p, co_p).astype(jnp.bfloat16)
    shift = jnp.zeros((1, co_p), jnp.float32).at[0, :co].set(beta - mean * inv)
    return w_flat, shift


# -------------------------------------- DownBlock ---------------------------------------

def down_block_forward_nhwc(x_nhwc, params):
    """DownBlock forward on an NHWC activation (preferred TPU layout)."""
    n, h, w, cin = x_nhwc.shape
    assert h % 4 == 0 and w % 2 == 0, "DownBlock kernel requires H % 4 == 0 and W % 2 == 0"
    hp, wp = h // 2, w // 2
    cmid = params["w1"].shape[-1]
    cout = params["w2"].shape[-1]
    ci_p = _round_up(cin, _LANE)
    cm_p = _round_up(cmid, _LANE)
    co_p = _round_up(cout, _LANE)
    # wq >= wp + 3 so the right SAME-pad column exists and wrap-around taps only ever
    # reach masked / discarded columns.
    wq = _round_up(wp + 3, _WIDTH_ALIGN)
    vmem_limit = _vmem_limit_bytes()

    w1, s1 = _fold_bn(params["w1"], params["g1"], params["b1"],
                      params["m1"], params["v1"], ci_p, cm_p)
    w2, s2 = _fold_bn(params["w2"], params["g2"], params["b2"],
                      params["m2"], params["v2"], cm_p, co_p)

    # bf16 activations; pad spatially (rows: 2 top/bottom -> 1 pooled zero row each;
    # cols: 4 left -> 2 pooled zero cols so conv1's output lands in conv2's padded
    # column positions) and pad channels to 128 lanes.  The reshape is contiguous and
    # packs adjacent column pairs into the lane axis for the in-kernel horizontal pool.
    x = x_nhwc.astype(jnp.bfloat16)
    x = jnp.pad(x, ((0, 0), (2, 2), (4, 2 * wq - w - 4), (0, ci_p - cin)))
    x = x.reshape(n, h + 4, wq, 2 * ci_p)

    y1 = _pool_conv_bn_relu(x, w1, s1, hp=hp, wp=wp, wq=wq,
                            ci_p=ci_p, co_p=cm_p, vmem_limit=vmem_limit)
    y2 = _conv_bn_relu(y1, w2, s2, hp=hp, wp=wp, wq=wq,
                       ci_p=cm_p, co_p=co_p, vmem_limit=vmem_limit)
    return y2[:, :, :wp, :cout]


@jax.jit
def down_block_forward(x_nchw, params):
    # NCHW (PyTorch convention) -> NHWC at the boundary only.
    x = jnp.transpose(x_nchw, (0, 2, 3, 1))
    y = down_block_forward_nhwc(x, params)
    return jnp.transpose(y, (0, 3, 1, 2)).astype(jnp.float32)


def init_down_block_params(key, in_channels, out_channels, mid_channels=None):
    if mid_channels is None:
        mid_channels = out_channels
    ks = jax.random.split(key, 10)

    def bn(kg, kb, km, kv, c):
        return (1.0 + 0.1 * jax.random.normal(kg, (c,), jnp.float32),
                0.1 * jax.random.normal(kb, (c,), jnp.float32),
                0.1 * jax.random.normal(km, (c,), jnp.float32),
                1.0 + 0.1 * jax.random.uniform(kv, (c,), jnp.float32))

    g1, b1, m1, v1 = bn(ks[1], ks[2], ks[3], ks[4], mid_channels)
    g2, b2, m2, v2 = bn(ks[6], ks[7], ks[8], ks[9], out_channels)
    return {
        "w1": 0.1 * jax.random.normal(ks[0], (3, 3, in_channels, mid_channels), jnp.float32),
        "g1": g1, "b1": b1, "m1": m1, "v1": v1,
        "w2": 0.1 * jax.random.normal(ks[5], (3, 3, mid_channels, out_channels), jnp.float32),
        "g2": g2, "b2": b2, "m2": m2, "v2": v2,
    }


# ------------------------------ plain-JAX reference -------------------------------------

def _ref_forward(x_nchw, params, eps=1e-5):
    x = jax.lax.reduce_window(x_nchw, -jnp.inf, jax.lax.max,
                              (1, 1, 2, 2), (1, 1, 2, 2), "VALID")

    def block(x, w, g, b, m, v):
        y = jax.lax.conv_general_dilated(
            x, w, window_strides=(1, 1), padding="SAME",
            dimension_numbers=("NCHW", "HWIO", "NCHW"))
        inv = (g / jnp.sqrt(v + eps)).reshape(1, -1, 1, 1)
        y = (y - m.reshape(1, -1, 1, 1)) * inv + b.reshape(1, -1, 1, 1)
        return jnp.maximum(y, 0.0)

    x = block(x, params["w1"], params["g1"], params["b1"], params["m1"], params["v1"])
    x = block(x, params["w2"], params["g2"], params["b2"], params["m2"], params["v2"])
    return x


# ------------------------------------------ main ----------------------------------------

if __name__ == "__main__":
    key = jax.random.PRNGKey(0)
    kx, kp = jax.random.split(key)

    N, Cin, Cout, H, W = 2, 4, 8, 16, 16
    x = jax.random.normal(kx, (N, Cin, H, W), jnp.float32)     # NCHW like PyTorch
    params = init_down_block_params(kp, Cin, Cout)

    out = jax.block_until_ready(down_block_forward(x, params))
    assert out.shape == (N, Cout, H // 2, W // 2), out.shape

    ref = _ref_forward(x, params)
    max_err = float(jnp.max(jnp.abs(out - ref)))
    # bf16 activations/weights/intermediates on the MXU vs. an all-f32 reference.
    assert max_err < 5e-2, f"max abs error vs reference too large: {max_err}"

    print("KERNEL_OK")
</pallas_src>

<mosaic_0001>
module attributes {stable_mosaic.version = 11 : i64} {
  func.func @_pool_conv_kernel(%arg0: i32, %arg1: i32, %arg2: memref<1x16x16x256xbf16, #tpu.memory_space<vmem>>, %arg3: memref<1x4x16x256xbf16, #tpu.memory_space<vmem>>, %arg4: memref<1152x128xbf16, #tpu.memory_space<vmem>>, %arg5: memref<1x128xf32, #tpu.memory_space<vmem>>, %arg6: memref<1x8x16x128xbf16, #tpu.memory_space<vmem>>, %arg7: memref<176x128xbf16, #tpu.memory_space<vmem>>) attributes {dimension_semantics = [#tpu.dimension_semantics<parallel>, #tpu.dimension_semantics<parallel>], iteration_bounds = array<i64: 2, 1>, scalar_prefetch = 0 : i64, scratch_operands = 1 : i64, tpu.core_type = #tpu.core_type<tc>, window_params = [{transform_indices = @transform_0, window_bounds = array<i64: 1, 16, 16, 256>}, {transform_indices = @transform_1, window_bounds = array<i64: 1, 4, 16, 256>}, {pipeline_mode = #tpu.pipeline_mode<synchronous>, transform_indices = @transform_2, window_bounds = array<i64: 1152, 128>}, {pipeline_mode = #tpu.pipeline_mode<synchronous>, transform_indices = @transform_3, window_bounds = array<i64: 1, 128>}, {transform_indices = @transform_4, window_bounds = array<i64: 1, 8, 16, 128>}]} {
    %c0 = arith.constant 0 : index
    %c0_0 = arith.constant 0 : index
    %c0_1 = arith.constant 0 : index
    %c0_2 = arith.constant 0 : index
    %0 = vector.load %arg2[%c0, %c0_0, %c0_1, %c0_2] : memref<1x16x16x256xbf16, #tpu.memory_space<vmem>>, vector<1x16x16x256xbf16>
    %1 = vector.shape_cast %0 : vector<1x16x16x256xbf16> to vector<16x16x256xbf16>
    %2 = vector.extract_strided_slice %1 {offsets = [0, 0, 0], sizes = [16, 16, 128], strides = [1, 1, 1]} : vector<16x16x256xbf16> to vector<16x16x128xbf16>
    %3 = vector.extract_strided_slice %1 {offsets = [0, 0, 128], sizes = [16, 16, 128], strides = [1, 1, 1]} : vector<16x16x256xbf16> to vector<16x16x128xbf16>
    %4 = arith.maximumf %2, %3 : vector<16x16x128xbf16>
    %5 = vector.shape_cast %4 : vector<16x16x128xbf16> to vector<8x2x16x128xbf16>
    %cst = arith.constant dense<0xFF80> : vector<8x16x128xbf16>
    %6 = vector.multi_reduction <maximumf>, %5, %cst [1] : vector<8x2x16x128xbf16> to vector<8x16x128xbf16>
    %7 = vector.shape_cast %6 : vector<8x16x128xbf16> to vector<128x128xbf16>
    %c0_3 = arith.constant 0 : index
    %c0_4 = arith.constant 0 : index
    %8 = vector.load %arg7[%c0_3, %c0_4] : memref<176x128xbf16, #tpu.memory_space<vmem>>, vector<128x128xbf16>
    tpu.vector_store %arg7[%c0_3, %c0_4], %7 {strides = array<i32>} : memref<176x128xbf16, #tpu.memory_space<vmem>>, vector<128x128xbf16>,
    %c0_5 = arith.constant 0 : index
    %c0_6 = arith.constant 0 : index
    %c0_7 = arith.constant 0 : index
    %c0_8 = arith.constant 0 : index
    %9 = vector.load %arg3[%c0_5, %c0_6, %c0_7, %c0_8] : memref<1x4x16x256xbf16, #tpu.memory_space<vmem>>, vector<1x4x16x256xbf16>
    %10 = vector.shape_cast %9 : vector<1x4x16x256xbf16> to vector<4x16x256xbf16>
    %11 = vector.extract_strided_slice %10 {offsets = [0, 0, 0], sizes = [4, 16, 128], strides = [1, 1, 1]} : vector<4x16x256xbf16> to vector<4x16x128xbf16>
    %12 = vector.extract_strided_slice %10 {offsets = [0, 0, 128], sizes = [4, 16, 128], strides = [1, 1, 1]} : vector<4x16x256xbf16> to vector<4x16x128xbf16>
    %13 = arith.maximumf %11, %12 : vector<4x16x128xbf16>
    %14 = vector.shape_cast %13 : vector<4x16x128xbf16> to vector<2x2x16x128xbf16>
    %cst_9 = arith.constant dense<0xFF80> : vector<2x16x128xbf16>
    %15 = vector.multi_reduction <maximumf>, %14, %cst_9 [1] : vector<2x2x16x128xbf16> to vector<2x16x128xbf16>
    %16 = vector.shape_cast %15 : vector<2x16x128xbf16> to vector<32x128xbf16>
    %c128 = arith.constant 128 : index
    %c0_10 = arith.constant 0 : index
    %17 = vector.load %arg7[%c128, %c0_10] : memref<176x128xbf16, #tpu.memory_space<vmem>>, vector<32x128xbf16>
    tpu.vector_store %arg7[%c128, %c0_10], %16 {strides = array<i32>} : memref<176x128xbf16, #tpu.memory_space<vmem>>, vector<32x128xbf16>,
    %cst_11 = arith.constant 0.000000e+00 : bf16
    %18 = vector.broadcast %cst_11 : bf16 to vector<16x128xbf16>
    %c160 = arith.constant 160 : index
    %c0_12 = arith.constant 0 : index
    %19 = vector.load %arg7[%c160, %c0_12] : memref<176x128xbf16, #tpu.memory_space<vmem>>, vector<16x128xbf16>
    tpu.vector_store %arg7[%c160, %c0_12], %18 {strides = array<i32>} : memref<176x128xbf16, #tpu.memory_space<vmem>>, vector<16x128xbf16>,
    %c0_13 = arith.constant 0 : index
    %c0_14 = arith.constant 0 : index
    %20 = vector.load %arg7[%c0_13, %c0_14] : memref<176x128xbf16, #tpu.memory_space<vmem>>, vector<176x128xbf16>
    %21 = vector.extract_strided_slice %20 {offsets = [1, 0], sizes = [175, 128], strides = [1, 1]} : vector<176x128xbf16> to vector<175x128xbf16>
    %22 = vector.extract_strided_slice %20 {offsets = [2, 0], sizes = [174, 128], strides = [1, 1]} : vector<176x128xbf16> to vector<174x128xbf16>
    %23 = vector.extract_strided_slice %20 {offsets = [0, 0], sizes = [128, 128], strides = [1, 1]} : vector<176x128xbf16> to vector<128x128xbf16>
    %24 = vector.extract_strided_slice %21 {offsets = [0, 0], sizes = [128, 128], strides = [1, 1]} : vector<175x128xbf16> to vector<128x128xbf16>
    %25 = vector.extract_strided_slice %22 {offsets = [0, 0], sizes = [128, 128], strides = [1, 1]} : vector<174x128xbf16> to vector<128x128xbf16>
    %26 = vector.extract_strided_slice %20 {offsets = [16, 0], sizes = [128, 128], strides = [1, 1]} : vector<176x128xbf16> to vector<128x128xbf16>
    %27 = vector.extract_strided_slice %21 {offsets = [16, 0], sizes = [128, 128], strides = [1, 1]} : vector<175x128xbf16> to vector<128x128xbf16>
    %28 = vector.extract_strided_slice %22 {offsets = [16, 0], sizes = [128, 128], strides = [1, 1]} : vector<174x128xbf16> to vector<128x128xbf16>
    %29 = vector.extract_strided_slice %20 {offsets = [32, 0], sizes = [128, 128], strides = [1, 1]} : vector<176x128xbf16> to vector<128x128xbf16>
    %30 = vector.extract_strided_slice %21 {offsets = [32, 0], sizes = [128, 128], strides = [1, 1]} : vector<175x128xbf16> to vector<128x128xbf16>
    %31 = vector.extract_strided_slice %22 {offsets = [32, 0], sizes = [128, 128], strides = [1, 1]} : vector<174x128xbf16> to vector<128x128xbf16>
    %32 = tpu.concatenate %23, %24, %25, %26, %27, %28, %29, %30, %31 in 1 : vector<128x128xbf16>, vector<128x128xbf16>, vector<128x128xbf16>, vector<128x128xbf16>, vector<128x128xbf16>, vector<128x128xbf16>, vector<128x128xbf16>, vector<128x128xbf16>, vector<128x128xbf16> -> vector<128x1152xbf16>
    %c0_15 = arith.constant 0 : index
    %c0_16 = arith.constant 0 : index
    %33 = vector.load %arg4[%c0_15, %c0_16] : memref<1152x128xbf16, #tpu.memory_space<vmem>>, vector<1152x128xbf16>
    %cst_17 = arith.constant dense<0.000000e+00> : vector<128x128xf32>
    %34 = tpu.matmul %32, %33, %cst_17 {dimension_numbers = #tpu.dot_dimension_numbers<[1], [0], [0], [1], [0, 0, 1, 1], [], []>} : vector<128x1152xbf16>, vector<1152x128xbf16>, vector<128x128xf32> -> vector<128x128xf32>
    %c0_18 = arith.constant 0 : index
    %c0_19 = arith.constant 0 : index
    %35 = vector.load %arg5[%c0_18, %c0_19] : memref<1x128xf32, #tpu.memory_space<vmem>>, vector<1x128xf32>
    %36 = vector.broadcast %35 : vector<1x128xf32> to vector<128x128xf32>
    %37 = arith.addf %34, %36 : vector<128x128xf32>
    %cst_20 = arith.constant 0.000000e+00 : f32
    %38 = vector.broadcast %cst_20 : f32 to vector<128x128xf32>
    %39 = arith.maximumf %37, %38 : vector<128x128xf32>
    %40 = vector.shape_cast %39 : vector<128x128xf32> to vector<8x16x128xf32>
    %41 = tpu.iota {dimensions = array<i32: 1>} : vector<1x16x1xi32>
    %c1_i32 = arith.constant 1 : i32
    %42 = vector.broadcast %c1_i32 : i32 to vector<1x16x1xi32>
    %43 = arith.cmpi sge, %41, %42 : vector<1x16x1xi32>
    %c8_i32 = arith.constant 8 : i32
    %44 = vector.broadcast %c8_i32 : i32 to vector<1x16x1xi32>
    %45 = arith.cmpi sle, %41, %44 : vector<1x16x1xi32>
    %46 = arith.andi %43, %45 : vector<1x16x1xi1>
    %cst_21 = arith.constant 0.000000e+00 : f32
    %47 = vector.shape_cast %46 : vector<1x16x1xi1> to vector<1x16x1xi1>
    %48 = vector.broadcast %47 : vector<1x16x1xi1> to vector<8x16x128xi1>
    %49 = vector.broadcast %cst_21 : f32 to vector<8x16x128xf32>
    %50 = arith.select %48, %40, %49 : vector<8x16x128xi1>, vector<8x16x128xf32>
    %51 = arith.truncf %50 : vector<8x16x128xf32> to vector<8x16x128xbf16>
    %c0_22 = arith.constant 0 : index
    %c0_23 = arith.constant 0 : index
    %c0_24 = arith.constant 0 : index
    %c0_25 = arith.constant 0 : index
    %52 = vector.load %arg6[%c0_22, %c0_23, %c0_24, %c0_25] : memref<1x8x16x128xbf16, #tpu.memory_space<vmem>>, vector<1x8x16x128xbf16>
    %53 = vector.shape_cast %52 : vector<1x8x16x128xbf16> to vector<8x16x128xbf16>
    %54 = vector.shape_cast %51 : vector<8x16x128xbf16> to vector<1x8x16x128xbf16>
    tpu.vector_store %arg6[%c0_22, %c0_23, %c0_24, %c0_25], %54 {strides = array<i32>} : memref<1x8x16x128xbf16, #tpu.memory_space<vmem>>, vector<1x8x16x128xbf16>,
    return
  }
  func.func @transform_0(%arg0: i32, %arg1: i32) -> (i32, i32, i32, i32) {
    %c0_i32 = arith.constant 0 : i32
    %c0_i32_0 = arith.constant 0 : i32
    %c0_i32_1 = arith.constant 0 : i32
    return %arg0, %arg1, %c0_i32, %c0_i32_0 : i32, i32, i32, i32
  }
  func.func @transform_1(%arg0: i32, %arg1: i32) -> (i32, i32, i32, i32) {
    %c1_i32 = arith.constant 1 : i32
    %0 = arith.addi %arg1, %c1_i32 : i32
    %c4_i32 = arith.constant 4 : i32
    %1 = arith.muli %0, %c4_i32 : i32
    %c0_i32 = arith.constant 0 : i32
    %c0_i32_0 = arith.constant 0 : i32
    %c0_i32_1 = arith.constant 0 : i32
    return %arg0, %1, %c0_i32, %c0_i32_0 : i32, i32, i32, i32
  }
  func.func @transform_2(%arg0: i32, %arg1: i32) -> (i32, i32) {
    %c0_i32 = arith.constant 0 : i32
    %c0_i32_0 = arith.constant 0 : i32
    %c0_i32_1 = arith.constant 0 : i32
    return %c0_i32, %c0_i32_0 : i32, i32
  }
  func.func @transform_3(%arg0: i32, %arg1: i32) -> (i32, i32) {
    %c0_i32 = arith.constant 0 : i32
    %c0_i32_0 = arith.constant 0 : i32
    %c0_i32_1 = arith.constant 0 : i32
    return %c0_i32, %c0_i32_0 : i32, i32
  }
  func.func @transform_4(%arg0: i32, %arg1: i32) -> (i32, i32, i32, i32) {
    %c0_i32 = arith.constant 0 : i32
    %c0_i32_0 = arith.constant 0 : i32
    %c0_i32_1 = arith.constant 0 : i32
    return %arg0, %arg1, %c0_i32, %c0_i32_0 : i32, i32, i32, i32
  }
}

module attributes {stable_mosaic.version = 11 : i64} {
  func.func @_conv_kernel(%arg0: i32, %arg1: i32, %arg2: memref<1x8x16x128xbf16, #tpu.memory_space<vmem>>, %arg3: memref<1x1x16x128xbf16, #tpu.memory_space<vmem>>, %arg4: memref<1x1x16x128xbf16, #tpu.memory_space<vmem>>, %arg5: memref<1152x128xbf16, #tpu.memory_space<vmem>>, %arg6: memref<1x128xf32, #tpu.memory_space<vmem>>, %arg7: memref<1x8x16x128xbf16, #tpu.memory_space<vmem>>, %arg8: memref<176x128xbf16, #tpu.memory_space<vmem>>) attributes {dimension_semantics = [#tpu.dimension_semantics<parallel>, #tpu.dimension_semantics<parallel>], iteration_bounds = array<i64: 2, 1>, scalar_prefetch = 0 : i64, scratch_operands = 1 : i64, tpu.core_type = #tpu.core_type<tc>, window_params = [{transform_indices = @transform_0, window_bounds = array<i64: 1, 8, 16, 128>}, {transform_indices = @transform_1, window_bounds = array<i64: 1, 1, 16, 128>}, {transform_indices = @transform_2, window_bounds = array<i64: 1, 1, 16, 128>}, {pipeline_mode = #tpu.pipeline_mode<synchronous>, transform_indices = @transform_3, window_bounds = array<i64: 1152, 128>}, {pipeline_mode = #tpu.pipeline_mode<synchronous>, transform_indices = @transform_4, window_bounds = array<i64: 1, 128>}, {transform_indices = @transform_5, window_bounds = array<i64: 1, 8, 16, 128>}]} {
    %cst = arith.constant 0.000000e+00 : bf16
    %0 = vector.broadcast %cst : bf16 to vector<16x128xbf16>
    %c0 = arith.constant 0 : index
    %c0_0 = arith.constant 0 : index
    %c0_1 = arith.constant 0 : index
    %c0_2 = arith.constant 0 : index
    %1 = vector.load %arg3[%c0, %c0_0, %c0_1, %c0_2] : memref<1x1x16x128xbf16, #tpu.memory_space<vmem>>, vector<1x1x16x128xbf16>
    %2 = vector.shape_cast %1 : vector<1x1x16x128xbf16> to vector<16x128xbf16>
    %c0_3 = arith.constant 0 : index
    %c0_4 = arith.constant 0 : index
    %3 = vector.load %arg8[%c0_3, %c0_4] : memref<176x128xbf16, #tpu.memory_space<vmem>>, vector<16x128xbf16>
    tpu.vector_store %arg8[%c0_3, %c0_4], %2 {strides = array<i32>} : memref<176x128xbf16, #tpu.memory_space<vmem>>, vector<16x128xbf16>,
    %c0_i32 = arith.constant 0 : i32
    %4 = arith.cmpi eq, %arg1, %c0_i32 : i32
    %5 = arith.extui %4 : i1 to i32
    %c0_i32_5 = arith.constant 0 : i32
    %6 = arith.cmpi ne, %5, %c0_i32_5 : i32
    scf.if %6 {
      %c0_31 = arith.constant 0 : index
      %c0_32 = arith.constant 0 : index
      %43 = vector.load %arg8[%c0_31, %c0_32] : memref<176x128xbf16, #tpu.memory_space<vmem>>, vector<16x128xbf16>
      tpu.vector_store %arg8[%c0_31, %c0_32], %0 {strides = array<i32>} : memref<176x128xbf16, #tpu.memory_space<vmem>>, vector<16x128xbf16>,
    } else {
    }
    %c0_6 = arith.constant 0 : index
    %c0_7 = arith.constant 0 : index
    %c0_8 = arith.constant 0 : index
    %c0_9 = arith.constant 0 : index
    %7 = vector.load %arg2[%c0_6, %c0_7, %c0_8, %c0_9] : memref<1x8x16x128xbf16, #tpu.memory_space<vmem>>, vector<1x8x16x128xbf16>
    %8 = vector.shape_cast %7 : vector<1x8x16x128xbf16> to vector<8x16x128xbf16>
    %9 = vector.shape_cast %8 : vector<8x16x128xbf16> to vector<128x128xbf16>
    %c16 = arith.constant 16 : index
    %c0_10 = arith.constant 0 : index
    %10 = vector.load %arg8[%c16, %c0_10] : memref<176x128xbf16, #tpu.memory_space<vmem>>, vector<128x128xbf16>
    tpu.vector_store %arg8[%c16, %c0_10], %9 {strides = array<i32>} : memref<176x128xbf16, #tpu.memory_space<vmem>>, vector<128x128xbf16>,
    %c0_11 = arith.constant 0 : index
    %c0_12 = arith.constant 0 : index
    %c0_13 = arith.constant 0 : index
    %c0_14 = arith.constant 0 : index
    %11 = vector.load %arg4[%c0_11, %c0_12, %c0_13, %c0_14] : memref<1x1x16x128xbf16, #tpu.memory_space<vmem>>, vector<1x1x16x128xbf16>
    %12 = vector.shape_cast %11 : vector<1x1x16x128xbf16> to vector<16x128xbf16>
    %c144 = arith.constant 144 : index
    %c0_15 = arith.constant 0 : index
    %13 = vector.load %arg8[%c144, %c0_15] : memref<176x128xbf16, #tpu.memory_space<vmem>>, vector<16x128xbf16>
    tpu.vector_store %arg8[%c144, %c0_15], %12 {strides = array<i32>} : memref<176x128xbf16, #tpu.memory_space<vmem>>, vector<16x128xbf16>,
    %c0_i32_16 = arith.constant 0 : i32
    %14 = arith.cmpi eq, %arg1, %c0_i32_16 : i32
    %15 = arith.extui %14 : i1 to i32
    %c0_i32_17 = arith.constant 0 : i32
    %16 = arith.cmpi ne, %15, %c0_i32_17 : i32
    scf.if %16 {
      %c144_31 = arith.constant 144 : index
      %c0_32 = arith.constant 0 : index
      %43 = vector.load %arg8[%c144_31, %c0_32] : memref<176x128xbf16, #tpu.memory_space<vmem>>, vector<16x128xbf16>
      tpu.vector_store %arg8[%c144_31, %c0_32], %0 {strides = array<i32>} : memref<176x128xbf16, #tpu.memory_space<vmem>>, vector<16x128xbf16>,
    } else {
    }
    %c160 = arith.constant 160 : index
    %c0_18 = arith.constant 0 : index
    %17 = vector.load %arg8[%c160, %c0_18] : memref<176x128xbf16, #tpu.memory_space<vmem>>, vector<16x128xbf16>
    tpu.vector_store %arg8[%c160, %c0_18], %0 {strides = array<i32>} : memref<176x128xbf16, #tpu.memory_space<vmem>>, vector<16x128xbf16>,
    %c0_19 = arith.constant 0 : index
    %c0_20 = arith.constant 0 : index
    %18 = vector.load %arg8[%c0_19, %c0_20] : memref<176x128xbf16, #tpu.memory_space<vmem>>, vector<176x128xbf16>
    %19 = vector.extract_strided_slice %18 {offsets = [1, 0], sizes = [175, 128], strides = [1, 1]} : vector<176x128xbf16> to vector<175x128xbf16>
    %20 = vector.extract_strided_slice %18 {offsets = [2, 0], sizes = [174, 128], strides = [1, 1]} : vector<176x128xbf16> to vector<174x128xbf16>
    %21 = vector.extract_strided_slice %18 {offsets = [0, 0], sizes = [128, 128], strides = [1, 1]} : vector<176x128xbf16> to vector<128x128xbf16>
    %22 = vector.extract_strided_slice %19 {offsets = [0, 0], sizes = [128, 128], strides = [1, 1]} : vector<175x128xbf16> to vector<128x128xbf16>
    %23 = vector.extract_strided_slice %20 {offsets = [0, 0], sizes = [128, 128], strides = [1, 1]} : vector<174x128xbf16> to vector<128x128xbf16>
    %24 = vector.extract_strided_slice %18 {offsets = [16, 0], sizes = [128, 128], strides = [1, 1]} : vector<176x128xbf16> to vector<128x128xbf16>
    %25 = vector.extract_strided_slice %19 {offsets = [16, 0], sizes = [128, 128], strides = [1, 1]} : vector<175x128xbf16> to vector<128x128xbf16>
    %26 = vector.extract_strided_slice %20 {offsets = [16, 0], sizes = [128, 128], strides = [1, 1]} : vector<174x128xbf16> to vector<128x128xbf16>
    %27 = vector.extract_strided_slice %18 {offsets = [32, 0], sizes = [128, 128], strides = [1, 1]} : vector<176x128xbf16> to vector<128x128xbf16>
    %28 = vector.extract_strided_slice %19 {offsets = [32, 0], sizes = [128, 128], strides = [1, 1]} : vector<175x128xbf16> to vector<128x128xbf16>
    %29 = vector.extract_strided_slice %20 {offsets = [32, 0], sizes = [128, 128], strides = [1, 1]} : vector<174x128xbf16> to vector<128x128xbf16>
    %30 = tpu.concatenate %21, %22, %23, %24, %25, %26, %27, %28, %29 in 1 : vector<128x128xbf16>, vector<128x128xbf16>, vector<128x128xbf16>, vector<128x128xbf16>, vector<128x128xbf16>, vector<128x128xbf16>, vector<128x128xbf16>, vector<128x128xbf16>, vector<128x128xbf16> -> vector<128x1152xbf16>
    %c0_21 = arith.constant 0 : index
    %c0_22 = arith.constant 0 : index
    %31 = vector.load %arg5[%c0_21, %c0_22] : memref<1152x128xbf16, #tpu.memory_space<vmem>>, vector<1152x128xbf16>
    %cst_23 = arith.constant dense<0.000000e+00> : vector<128x128xf32>
    %32 = tpu.matmul %30, %31, %cst_23 {dimension_numbers = #tpu.dot_dimension_numbers<[1], [0], [0], [1], [0, 0, 1, 1], [], []>} : vector<128x1152xbf16>, vector<1152x128xbf16>, vector<128x128xf32> -> vector<128x128xf32>
    %c0_24 = arith.constant 0 : index
    %c0_25 = arith.constant 0 : index
    %33 = vector.load %arg6[%c0_24, %c0_25] : memref<1x128xf32, #tpu.memory_space<vmem>>, vector<1x128xf32>
    %34 = vector.broadcast %33 : vector<1x128xf32> to vector<128x128xf32>
    %35 = arith.addf %32, %34 : vector<128x128xf32>
    %cst_26 = arith.constant 0.000000e+00 : f32
    %36 = vector.broadcast %cst_26 : f32 to vector<128x128xf32>
    %37 = arith.maximumf %35, %36 : vector<128x128xf32>
    %38 = vector.shape_cast %37 : vector<128x128xf32> to vector<8x16x128xf32>
    %39 = arith.truncf %38 : vector<8x16x128xf32> to vector<8x16x128xbf16>
    %c0_27 = arith.constant 0 : index
    %c0_28 = arith.constant 0 : index
    %c0_29 = arith.constant 0 : index
    %c0_30 = arith.constant 0 : index
    %40 = vector.load %arg7[%c0_27, %c0_28, %c0_29, %c0_30] : memref<1x8x16x128xbf16, #tpu.memory_space<vmem>>, vector<1x8x16x128xbf16>
    %41 = vector.shape_cast %40 : vector<1x8x16x128xbf16> to vector<8x16x128xbf16>
    %42 = vector.shape_cast %39 : vector<8x16x128xbf16> to vector<1x8x16x128xbf16>
    tpu.vector_store %arg7[%c0_27, %c0_28, %c0_29, %c0_30], %42 {strides = array<i32>} : memref<1x8x16x128xbf16, #tpu.memory_space<vmem>>, vector<1x8x16x128xbf16>,
    return
  }
  func.func @transform_0(%arg0: i32, %arg1: i32) -> (i32, i32, i32, i32) {
    %c0_i32 = arith.constant 0 : i32
    %c0_i32_0 = arith.constant 0 : i32
    %c0_i32_1 = arith.constant 0 : i32
    return %arg0, %arg1, %c0_i32, %c0_i32_0 : i32, i32, i32, i32
  }
  func.func @transform_1(%arg0: i32, %arg1: i32) -> (i32, i32, i32, i32) {
    %c8_i32 = arith.constant 8 : i32
    %0 = arith.muli %arg1, %c8_i32 : i32
    %c1_i32 = arith.constant 1 : i32
    %1 = arith.subi %0, %c1_i32 : i32
    %c0_i32 = arith.constant 0 : i32
    %2 = arith.maxsi %1, %c0_i32 : i32
    %c0_i32_0 = arith.constant 0 : i32
    %c0_i32_1 = arith.constant 0 : i32
    %c0_i32_2 = arith.constant 0 : i32
    return %arg0, %2, %c0_i32_0, %c0_i32_1 : i32, i32, i32, i32
  }
  func.func @transform_2(%arg0: i32, %arg1: i32) -> (i32, i32, i32, i32) {
    %c1_i32 = arith.constant 1 : i32
    %0 = arith.addi %arg1, %c1_i32 : i32
    %c8_i32 = arith.constant 8 : i32
    %1 = arith.muli %0, %c8_i32 : i32
    %c7_i32 = arith.constant 7 : i32
    %2 = arith.minsi %1, %c7_i32 : i32
    %c0_i32 = arith.constant 0 : i32
    %c0_i32_0 = arith.constant 0 : i32
    %c0_i32_1 = arith.constant 0 : i32
    return %arg0, %2, %c0_i32, %c0_i32_0 : i32, i32, i32, i32
  }
  func.func @transform_3(%arg0: i32, %arg1: i32) -> (i32, i32) {
    %c0_i32 = arith.constant 0 : i32
    %c0_i32_0 = arith.constant 0 : i32
    %c0_i32_1 = arith.constant 0 : i32
    return %c0_i32, %c0_i32_0 : i32, i32
  }
  func.func @transform_4(%arg0: i32, %arg1: i32) -> (i32, i32) {
    %c0_i32 = arith.constant 0 : i32
    %c0_i32_0 = arith.constant 0 : i32
    %c0_i32_1 = arith.constant 0 : i32
    return %c0_i32, %c0_i32_0 : i32, i32
  }
  func.func @transform_5(%arg0: i32, %arg1: i32) -> (i32, i32, i32, i32) {
    %c0_i32 = arith.constant 0 : i32
    %c0_i32_0 = arith.constant 0 : i32
    %c0_i32_1 = arith.constant 0 : i32
    return %arg0, %arg1, %c0_i32, %c0_i32_0 : i32, i32, i32, i32
  }
}

</mosaic_0001>

<bundles_post_ra>
// kernel: down_block_forward.3
= control target key start
LH: loop header
LB: loop body
LE: loop exit
PB: predicated region body
PF: predicated region fallthrough
CT: control target
= control target key end

     0   :  { %s2468_s18 = smov 0   ;;  %s2470_s19 = smov 0   ;;  %s3030_s0 = inlined_call_operand.vmem [shape: bf16[2,8,16,128], index: 0, kind: input, shape index: {}, may-alias: {0,1,2}]   ;;  %s3031_s1 = inlined_call_operand.vmem [shape: bf16[2,8,16,128], index: 1, kind: input, shape index: {}, may-alias: {0,1,2}]   ;;  %s3032_s2 = inlined_call_operand.vmem [shape: bf16[2,8,16,128], index: 2, kind: input, shape index: {}, may-alias: {0,1,2}]   ;;  %s3033_s3 = inlined_call_operand.vmem [shape: bf16[1152,128], index: 3, kind: input, shape index: {}]   ;;  %s3034_s4 = inlined_call_operand.vmem [shape: f32[1,128], index: 4, kind: input, shape index: {}]   ;;  %s3035_s5 = inlined_call_operand.vmem [shape: bf16[2,8,16,128], index: 5, kind: output, shape index: {}]  }
   0x1   :  { %s2472_s20 = smov 0  }
   0x2 LB: > { %s27_s21 = sadd.s32 1, %s2431_s19  ;;  %p1889_p0 = scmp.ge.s32.totalorder %s2435_s20, 1  ;;  %s2435_s20 = sphi %s2472_s20, %s15_s20   ;;  %s2431_s19 = sphi %s2470_s19, %s3037_s19   ;;  %s2427_s18 = sphi %s2468_s18, %s3036_s18  }
   0x3   : > { %p29_p1 = scmp.ge.s32.totalorder %s27_s21, 2  ;;  %p273_p2 = scmp.lt.s32.totalorder %s2435_s20, 3 }
   0x5   : > { %s3039_s21 = smov (%p29_p1, %s27_s21), 0  ;;  %p274_p3 = pnand %p1889_p0, %p273_p2 }
   0x6   : > { %p338_p4 = scmp.lt.s32.totalorder (!%p274_p3), %s2427_s18, 1 }
   0x7   : > { %277 = sbr.rel (%p274_p3) target bundleno = 467 (0x1d3), region = 40 }
   0xc   : > { %v2240_v0 = vld [vmem:[%s3033_s3 + $0x38] sm:$0xff]  ;;  %v2239_v1 = vld [vmem:[%s3033_s3 + $0x30] sm:$0xff]  ;;  %s3041_s18 = smov (!%p338_p4, %s2427_s18), 1  ;;  %v2437_v2 = vmov 0   ;;  %v2238_v3 = vld [vmem:[%s3033_s3 + $0x28] sm:$0xff]  ;;  %vm596_vm1 = vcmask 1046528  }
   0xd   : > { %2363 = vmatpush.bf16.msra.mxu1 %v2240_v0  ;;  %2364 = vmatpush.bf16.msra.mxu2 %v2240_v0  ;;  %445 = vst [vmem:[#allocation2 + $0x50] sm:$0xf] %v2437_v2  ;;  %s2493_s26 = sshll.u32 %s3041_s18, 6  ;;  %v2237_v8 = vld [vmem:[%s3033_s3 + $0x20] sm:$0xff]  ;;  %v2236_v13 = vld [vmem:[%s3033_s3 + $0x18] sm:$0xff]  ;;  %v2235_v14 = vld [vmem:[%s3033_s3 + $0x10] sm:$0xff] }
   0xe   : > { %2365 = vmatpush.bf16.msra.mxu3 %v2240_v0  ;;  %1258 = vmatpush.bf16.msra.mxu0 %v2240_v0  ;;  %s2502_s6 = scalar_lea.vmem %s3030_s0, %s2493_s26  ;;  %s360_s9 = scalar_lea.vmem %s3031_s1, %s2493_s26  ;;  %v2234_v15 = vld [vmem:[%s3033_s3 + $0x8] sm:$0xff]  ;;  %v2233_v16 = vld [vmem:[%s3033_s3] sm:$0xff]  ;;  %v2256_v17 = vld [vmem:[%s3033_s3 + $0xb8] sm:$0xff]  ;;  %vm519_vm0 = vsmask.f32 7424 }
   0xf   : > { %v406_v4 = vld [vmem:[%s2502_s6 + $0x8] sm:$0xff]   ;;  %v410_v5 = vld [vmem:[%s2502_s6 + $0x18] sm:$0xff]   ;;  %v394_v7 = vld [vmem:[%s360_s9] sm:$0xff]   ;;  %s2223_s12 = sadd.s32 56, %s2493_s26 }
  0x10   : > { %v414_v6 = vld [vmem:[%s2502_s6 + $0x28] sm:$0xff]   ;;  %422 = vst [vmem:[#allocation2 + $0x10] sm:$0xff] %v406_v4   ;;  %v408_v9 = vld [vmem:[%s2502_s6 + $0x10] sm:$0xff]   ;;  %v412_v10 = vld [vmem:[%s2502_s6 + $0x20] sm:$0xff]   ;;  %s377_s15 = scalar_lea.vmem %s3032_s2, %s2223_s12 }
  0x11   : > { %2366 = vmatpush.bf16.msra.mxu1 %v2239_v1  ;;  %2367 = vmatpush.bf16.msra.mxu2 %v2239_v1  ;;  %426 = vst [vmem:[#allocation2 + $0x20] sm:$0xff] %v410_v5   ;;  %v416_v11 = vld [vmem:[%s2502_s6 + $0x30] sm:$0xff]   ;;  %v404_v12 = vld [vmem:[%s2502_s6] sm:$0xff]   ;;  %v2248_v18 = vld [vmem:[%s3033_s3 + $0x78] sm:$0xff] }
  0x12   : > { %2368 = vmatpush.bf16.msra.mxu3 %v2239_v1  ;;  %1259 = vmatpush.bf16.msra.mxu0 %v2239_v1  ;;  %430 = vst [vmem:[#allocation2 + $0x30] sm:$0xff] %v414_v6   ;;  %v2264_v23 = vld [vmem:[%s3033_s3 + $0xf8] sm:$0xff]  ;;  %v2255_v25 = vld [vmem:[%s3033_s3 + $0xb0] sm:$0xff]  ;;  %v2254_v29 = vld [vmem:[%s3033_s3 + $0xa8] sm:$0xff] }
  0x13   : > { %396 = vst [vmem:[#allocation2] sm:$0xff] %v394_v7   ;;  %v2272_v24 = vld [vmem:[%s3033_s3 + $0x138] sm:$0xff]  ;;  %v2247_v26 = vld [vmem:[%s3033_s3 + $0x70] sm:$0xff]  ;;  %v2246_v30 = vld [vmem:[%s3033_s3 + $0x68] sm:$0xff] }
  0x14   : > { %402 = vst [vmem:[#allocation2] sm:$0xf] %v2437_v2  ;;  %v2263_v27 = vld [vmem:[%s3033_s3 + $0xf0] sm:$0xff]  ;;  %v2262_v31 = vld [vmem:[%s3033_s3 + $0xe8] sm:$0xff]  ;;  %v2253_v33 = vld [vmem:[%s3033_s3 + $0xa0] sm:$0xff] }
  0x15   : > { %2369 = vmatpush.bf16.msra.mxu1 %v2238_v3  ;;  %2370 = vmatpush.bf16.msra.mxu2 %v2238_v3  ;;  %403 = vst [vmem:[#allocation2 + $0x4] sm:$0xf] %v2437_v2  ;;  %v2271_v28 = vld [vmem:[%s3033_s3 + $0x130] sm:$0xff]  ;;  %v2270_v32 = vld [vmem:[%s3033_s3 + $0x128] sm:$0xff]  ;;  %v2245_v34 = vld [vmem:[%s3033_s3 + $0x60] sm:$0xff] }
  0x16   : > { %2371 = vmatpush.bf16.msra.mxu3 %v2238_v3  ;;  %1260 = vmatpush.bf16.msra.mxu0 %v2238_v3  ;;  %424 = vst [vmem:[#allocation2 + $0x18] sm:$0xff] %v408_v9   ;;  %v2261_v35 = vld [vmem:[%s3033_s3 + $0xe0] sm:$0xff]  ;;  %v2252_v37 = vld [vmem:[%s3033_s3 + $0x98] sm:$0xff]  ;;  %v2251_v45 = vld [vmem:[%s3033_s3 + $0x90] sm:$0xff] }
  0x17   : > { %428 = vst [vmem:[#allocation2 + $0x28] sm:$0xff] %v412_v10   ;;  %v2538_v19 = vld [vmem:[#allocation2 + $0x10] sm:$0xff]  ;;  %v2269_v36 = vld [vmem:[%s3033_s3 + $0x120] sm:$0xff]  ;;  %v2244_v38 = vld [vmem:[%s3033_s3 + $0x58] sm:$0xff] }
  0x18   : > { %432 = vst [vmem:[#allocation2 + $0x38] sm:$0xff] %v416_v11   ;;  %v2540_v20 = vld [vmem:[#allocation2 + $0x20] sm:$0xff]  ;;  %v2260_v43 = vld [vmem:[%s3033_s3 + $0xd8] sm:$0xff]  ;;  %v2243_v46 = vld [vmem:[%s3033_s3 + $0x50] sm:$0xff]  ;;  %v536_v59 = vshll.u32 %v2538_v19, 16 }
  0x19   : > { %2372 = vmatpush.bf16.msra.mxu1 %v2237_v8  ;;  %2373 = vmatpush.bf16.msra.mxu2 %v2237_v8  ;;  %420 = vst [vmem:[#allocation2 + $0x8] sm:$0xff] %v404_v12   ;;  %v2542_v21 = vld [vmem:[#allocation2 + $0x30] sm:$0xff]  ;;  %v2268_v44 = vld [vmem:[%s3033_s3 + $0x118] sm:$0xff]  ;;  %v2250_v51 = vld [vmem:[%s3033_s3 + $0x88] sm:$0xff] }
  0x1a   : > { %2374 = vmatpush.bf16.msra.mxu3 %v2237_v8  ;;  %1261 = vmatpush.bf16.msra.mxu0 %v2237_v8  ;;  %v2259_v48 = vld [vmem:[%s3033_s3 + $0xd0] sm:$0xff]  ;;  %v2242_v52 = vld [vmem:[%s3033_s3 + $0x48] sm:$0xff]  ;;  %v2249_v60 = vld [vmem:[%s3033_s3 + $0x80] sm:$0xff]  ;;  %v538_v7 = vrot.slane %v536_v59, 1 }
  0x1b   : > { %v2267_v49 = vld [vmem:[%s3033_s3 + $0x110] sm:$0xff]  ;;  %v2258_v55 = vld [vmem:[%s3033_s3 + $0xc8] sm:$0xff]  ;;  %v2241_v61 = vld [vmem:[%s3033_s3 + $0x40] sm:$0xff] }
  0x1c   : > { %v2544_v22 = vld [vmem:[#allocation2] sm:$0xff]  ;;  %v2266_v56 = vld [vmem:[%s3033_s3 + $0x108] sm:$0xff]  ;;  %v2288_v62 = vld [vmem:[%s3033_s3 + $0x1b8] sm:$0xff] }
  0x1d   : > { %2375 = vmatpush.bf16.msra.mxu1 %v2236_v13  ;;  %2376 = vmatpush.bf16.msra.mxu2 %v2236_v13  ;;  %v2598_v39 = vld [vmem:[#allocation2 + $0x18] sm:$0xff]  ;;  %v523_v47 = vshll.u32 %v2544_v22, 16  ;;  %v521_v53 = vshrl.u32 %v2544_v22, 16  ;;  %v597_v1 = vrot.slane %v2544_v22, 1  ;;  %v2257_v4 = vld [vmem:[%s3033_s3 + $0xc0] sm:$0xff]  ;;  %v2299_v59 = vld [vmem:[%s3033_s3 + $0x210] sm:$0xff] }
  0x1e   : > { %2377 = vmatpush.bf16.msra.mxu3 %v2236_v13  ;;  %1262 = vmatpush.bf16.msra.mxu0 %v2236_v13  ;;  %v2600_v40 = vld [vmem:[#allocation2 + $0x28] sm:$0xff]  ;;  %v2280_v63 = vld [vmem:[%s3033_s3 + $0x178] sm:$0xff]  ;;  %v2265_v5 = vld [vmem:[%s3033_s3 + $0x100] sm:$0xff] }
  0x1f   : > { %v2602_v41 = vld [vmem:[#allocation2 + $0x38] sm:$0xff]  ;;  %v525_v54 = vrot.slane %v523_v47, 1  ;;  %v2287_v13 = vld [vmem:[%s3033_s3 + $0x1b0] sm:$0xff] }
  0x20   : > { %v2604_v42 = vld [vmem:[#allocation2 + $0x8] sm:$0xff]  ;;  %v2296_v8 = vld [vmem:[%s3033_s3 + $0x1f8] sm:$0xff] }
  0x21   : > { %2378 = vmatpush.bf16.msra.mxu1 %v2235_v14  ;;  %2379 = vmatpush.bf16.msra.mxu2 %v2235_v14  ;;  %v528_v50 = vshll.u32 %v2604_v42, 16  ;;  %v532_v58 = vshrl.u32 %v2604_v42, 16  ;;  %v526_v0 = vor.u32 %v525_v54, %v521_v53  ;;  %v598_v3 = vrot.slane %v2604_v42, 1  ;;  %v2304_v9 = vld [vmem:[%s3033_s3 + $0x238] sm:$0xff] }
  0x22   : > { %2380 = vmatpush.bf16.msra.mxu3 %v2235_v14  ;;  %1263 = vmatpush.bf16.msra.mxu0 %v2235_v14  ;;  %v2279_v14 = vld [vmem:[%s3033_s3 + $0x170] sm:$0xff]  ;;  %v2276_v47 = vld [vmem:[%s3033_s3 + $0x158] sm:$0xff] }
  0x23   : > { %v530_v57 = vrot.slane %v528_v50, 1  ;;  %v599_v11 = vsel %vm596_vm1, %v597_v1, %v598_v3  ;;  %v560_v50 = vshll.u32 %v2600_v40, 16 }
  0x25   : > { %2381 = vmatpush.bf16.msra.mxu1 %v2234_v15  ;;  %2382 = vmatpush.bf16.msra.mxu2 %v2234_v15  ;;  %v534_v6 = vor.u32 %v532_v58, %v530_v57  ;;  %v531_v10 = vsel %vm519_vm0, %v526_v0, %v530_v57  ;;  %v562_v53 = vrot.slane %v560_v50, 1  ;;  %v2291_v57 = vld [vmem:[%s3033_s3 + $0x1d0] sm:$0xff] }
  0x26   : > { %2383 = vmatpush.bf16.msra.mxu3 %v2234_v15  ;;  %1264 = vmatpush.bf16.msra.mxu0 %v2234_v15  ;;  %v2295_v15 = vld [vmem:[%s3033_s3 + $0x1f0] sm:$0xff] }
  0x27   : > { %v539_v12 = vsel %vm519_vm0, %v534_v6, %v538_v7  ;;  %v2275_v58 = vld [vmem:[%s3033_s3 + $0x150] sm:$0xff]  ;;  %v2282_v6 = vld [vmem:[%s3033_s3 + $0x188] sm:$0xff] }
  0x29   : > { %2384 = vmatpush.bf16.msra.mxu1 %v2233_v16  ;;  %2385 = vmatpush.bf16.msra.mxu2 %v2233_v16 }
  0x2a   : > { %2386 = vmatpush.bf16.msra.mxu3 %v2233_v16  ;;  %1265 = vmatpush.bf16.msra.mxu0 %v2233_v16  ;;  %v2303_v16 = vld [vmem:[%s3033_s3 + $0x230] sm:$0xff] }
  0x2c   : > { %1276 = vmatmul.bf16.vlgmr.msra.gmra.mxu1 %v2538_v19  ;;  %1286 = vmatmul.bf16.vlgmr.msra.gmra.mxu2 %v2540_v20 }
  0x2d   : > { %1356 = vmatpush.bf16.msrb.mxu2 %v2256_v17  ;;  %1307 = vmatpush.bf16.msrb.mxu1 %v2248_v18  ;;  %v2286_v17 = vld [vmem:[%s3033_s3 + $0x1a8] sm:$0xff] }
  0x2e   : > { %1296 = vmatmul.bf16.vlgmr.msra.gmra.mxu3 %v2542_v21  ;;  %1266 = vmatmul.bf16.vlgmr.msra.gmra.mxu0 %v2544_v22  ;;  %v2278_v18 = vld [vmem:[%s3033_s3 + $0x168] sm:$0xff] }
  0x2f   : > { %1405 = vmatpush.bf16.msrb.mxu3 %v2264_v23  ;;  %1454 = vmatpush.bf16.msrb.mxu0 %v2272_v24  ;;  %v2294_v22 = vld [vmem:[%s3033_s3 + $0x1e8] sm:$0xff]  ;;  %v540_v24 = vshrl.u32 %v2538_v19, 16 }
  0x30   : > { %v2302_v23 = vld [vmem:[%s3033_s3 + $0x228] sm:$0xff] }
  0x31   : > { %1357 = vmatpush.bf16.msrb.mxu2 %v2255_v25  ;;  %1308 = vmatpush.bf16.msrb.mxu1 %v2247_v26  ;;  %v544_v25 = vshll.u32 %v2598_v39, 16  ;;  %v600_v26 = vrot.slane %v2538_v19, 1 }
  0x33   : > { %1406 = vmatpush.bf16.msrb.mxu3 %v2263_v27  ;;  %1455 = vmatpush.bf16.msrb.mxu0 %v2271_v28  ;;  %v542_v27 = vor.u32 %v540_v24, %v538_v7  ;;  %v546_v28 = vrot.slane %v544_v25, 1  ;;  %v2290_v7 = vld [vmem:[%s3033_s3 + $0x1c8] sm:$0xff]  ;;  %v2297_v25 = vld [vmem:[%s3033_s3 + $0x200] sm:$0xff] }
  0x35   : > { %1358 = vmatpush.bf16.msrb.mxu2 %v2254_v29  ;;  %1309 = vmatpush.bf16.msrb.mxu1 %v2246_v30  ;;  %v2703_v29 = vsel %vm596_vm1, %v598_v3, %v600_v26  ;;  %v2706_v30 = vsel %vm519_vm0, %v542_v27, %v546_v28 }
  0x37   : > { %1407 = vmatpush.bf16.msrb.mxu3 %v2262_v31  ;;  %1456 = vmatpush.bf16.msrb.mxu0 %v2270_v32  ;;  %v2285_v31 = vld [vmem:[%s3033_s3 + $0x1a0] sm:$0xff] }
  0x38   : > { %v2293_v32 = vld [vmem:[%s3033_s3 + $0x1e0] sm:$0xff] }
  0x39   : > { %1359 = vmatpush.bf16.msrb.mxu2 %v2253_v33  ;;  %1310 = vmatpush.bf16.msrb.mxu1 %v2245_v34  ;;  %v2277_v33 = vld [vmem:[%s3033_s3 + $0x160] sm:$0xff] }
  0x3a   : > { %v2301_v34 = vld [vmem:[%s3033_s3 + $0x220] sm:$0xff] }
  0x3b   : > { %1408 = vmatpush.bf16.msrb.mxu3 %v2261_v35  ;;  %1457 = vmatpush.bf16.msrb.mxu0 %v2269_v36  ;;  %v548_v35 = vshrl.u32 %v2598_v39, 16  ;;  %v552_v36 = vshll.u32 %v2540_v20, 16 }
  0x3c   : > { %1281 = vmatmul.bf16.gmra.mxu1 %v2598_v39  ;;  %1291 = vmatmul.bf16.gmra.mxu2 %v2600_v40 }
  0x3d   : > { %1360 = vmatpush.bf16.msrb.mxu2 %v2252_v37  ;;  %1311 = vmatpush.bf16.msrb.mxu1 %v2244_v38  ;;  %v602_v37 = vrot.slane %v2598_v39, 1  ;;  %v550_v38 = vor.u32 %v548_v35, %v546_v28 }
  0x3e   : > { %1301 = vmatmul.bf16.gmra.mxu3 %v2602_v41  ;;  %1271 = vmatmul.bf16.gmra.mxu0 %v2604_v42 }
  0x3f   : > { %1409 = vmatpush.bf16.msrb.mxu3 %v2260_v43  ;;  %1458 = vmatpush.bf16.msrb.mxu0 %v2268_v44  ;;  %v2727_v43 = vsel %vm596_vm1, %v600_v26, %v602_v37  ;;  %v2835_v26 = vrot.slane %v2602_v41, 1 }
  0x41   : > { %1361 = vmatpush.bf16.msrb.mxu2 %v2251_v45  ;;  %1312 = vmatpush.bf16.msrb.mxu1 %v2243_v46  ;;  %v2284_v45 = vld [vmem:[%s3033_s3 + $0x198] sm:$0xff] }
  0x42   : > { %v2292_v46 = vld [vmem:[%s3033_s3 + $0x1d8] sm:$0xff] }
  0x43   : > { %1410 = vmatpush.bf16.msrb.mxu3 %v2259_v48  ;;  %1459 = vmatpush.bf16.msrb.mxu0 %v2267_v49  ;;  %v2300_v48 = vld [vmem:[%s3033_s3 + $0x218] sm:$0xff]  ;;  %v556_v49 = vshrl.u32 %v2540_v20, 16 }
  0x45   : > { %1362 = vmatpush.bf16.msrb.mxu2 %v2250_v51  ;;  %1313 = vmatpush.bf16.msrb.mxu1 %v2242_v52  ;;  %v604_v51 = vrot.slane %v2540_v20, 1 }
  0x47   : > { %1411 = vmatpush.bf16.msrb.mxu3 %v2258_v55  ;;  %1460 = vmatpush.bf16.msrb.mxu0 %v2266_v56  ;;  %v2752_v54 = vsel %vm596_vm1, %v602_v37, %v604_v51  ;;  %v2283_v56 = vld [vmem:[%s3033_s3 + $0x190] sm:$0xff] }
  0x49   : > { %1363 = vmatpush.bf16.msrb.mxu2 %v2249_v60  ;;  %1314 = vmatpush.bf16.msrb.mxu1 %v2241_v61  ;;  %v418_v60 = vld [vmem:[%s2502_s6 + $0x38] sm:$0xff]   ;;  %v564_v61 = vshrl.u32 %v2600_v40, 16 }
  0x4a   : > { %434 = vst [vmem:[#allocation2 + $0x40] sm:$0xff] %v418_v60  }
  0x4b   : > { %1412 = vmatpush.bf16.msrb.mxu3 %v2257_v4  ;;  %1461 = vmatpush.bf16.msrb.mxu0 %v2265_v5  ;;  %v566_v0 = vor.u32 %v564_v61, %v562_v53  ;;  %v436_v5 = vld [vmem:[%s377_s15] sm:$0xff]   ;;  %s2997_s15 = scalar_lea.vmem %s3035_s5, %s2493_s26 }
  0x4c   : > { %1315 = vmatmul.bf16.vlgmr.msrb.gmra.mxu1 %v531_v10  ;;  %1364 = vmatmul.bf16.vlgmr.msrb.gmra.mxu2 %v599_v11  ;;  %438 = vst [vmem:[#allocation2 + $0x48] sm:$0xff] %v436_v5   ;;  %v576_v10 = vshll.u32 %v2602_v41, 16  ;;  %v2298_v11 = vld [vmem:[%s3033_s3 + $0x208] sm:$0xff] }
  0x4d   : > { %1552 = vmatpush.bf16.msra.mxu2 %v2288_v62  ;;  %1503 = vmatpush.bf16.msra.mxu1 %v2280_v63  ;;  %v568_v62 = vshll.u32 %v2542_v21, 16  ;;  %v606_v63 = vrot.slane %v2600_v40, 1  ;;  %443 = vst [vmem:[#allocation2 + $0x48] sm:$0xf] %v2437_v2 }
  0x4e   : > { %1413 = vmatmul.bf16.vlgmr.msrb.gmra.mxu3 %v2604_v42  ;;  %1462 = vmatmul.bf16.vlgmr.msrb.gmra.mxu0 %v539_v12  ;;  %v554_v42 = vrot.slane %v552_v36, 1  ;;  %444 = vst [vmem:[#allocation2 + $0x4c] sm:$0xf] %v2437_v2 }
  0x4f   : > { %1601 = vmatpush.bf16.msra.mxu3 %v2296_v8  ;;  %1650 = vmatpush.bf16.msra.mxu0 %v2304_v9  ;;  %v570_v1 = vrot.slane %v568_v62, 1  ;;  %v2779_v3 = vsel %vm596_vm1, %v604_v51, %v606_v63  ;;  %v2274_v8 = vld [vmem:[%s3033_s3 + $0x148] sm:$0xff]  ;;  %v572_v9 = vshrl.u32 %v2542_v21, 16 }
  0x50   : > { %v2730_v44 = vsel %vm519_vm0, %v550_v38, %v554_v42  ;;  %v558_v52 = vor.u32 %v556_v49, %v554_v42  ;;  %v2857_v42 = vld [vmem:[%s3034_s4] ss:$0 sm:$0xff] }
  0x51   : > { %1553 = vmatpush.bf16.msra.mxu2 %v2287_v13  ;;  %1504 = vmatpush.bf16.msra.mxu1 %v2279_v14  ;;  %v2785_v4 = vsel %vm519_vm0, %v566_v0, %v570_v1  ;;  %v574_v13 = vor.u32 %v572_v9, %v570_v1  ;;  %v578_v14 = vrot.slane %v576_v10, 1 }
  0x52   : > { %v2755_v55 = vsel %vm519_vm0, %v558_v52, %v562_v53 }
  0x53   : > { %1602 = vmatpush.bf16.msra.mxu3 %v2295_v15  ;;  %1651 = vmatpush.bf16.msra.mxu0 %v2303_v16  ;;  %v2812_v15 = vsel %vm519_vm0, %v574_v13, %v578_v14  ;;  %v2281_v16 = vld [vmem:[%s3033_s3 + $0x180] sm:$0xff] }
  0x55   : > { %1554 = vmatpush.bf16.msra.mxu2 %v2286_v17  ;;  %1505 = vmatpush.bf16.msra.mxu1 %v2278_v18  ;;  %v2289_v17 = vld [vmem:[%s3033_s3 + $0x1c0] sm:$0xff] }
  0x56   : > { %v2824_v18 = vld [vmem:[#allocation2 + $0x40] sm:$0xff]  }
  0x57   : > { %1603 = vmatpush.bf16.msra.mxu3 %v2294_v22  ;;  %1652 = vmatpush.bf16.msra.mxu0 %v2302_v23  ;;  %v2273_v22 = vld [vmem:[%s3033_s3 + $0x140] sm:$0xff]  ;;  %v580_v23 = vshrl.u32 %v2602_v41, 16  ;;  %v630_v24 = vshll.u32 %v2824_v18, 16  ;;  %v634_v53 = vshrl.u32 %v2824_v18, 16 }
  0x59   : > { %1555 = vmatpush.bf16.msra.mxu2 %v2285_v31  ;;  %1506 = vmatpush.bf16.msra.mxu1 %v2277_v33  ;;  %v582_v27 = vor.u32 %v580_v23, %v578_v14  ;;  %v632_v28 = vrot.slane %v630_v24, 1  ;;  %v2837_v31 = vld [vmem:[#allocation2 + $0x48] sm:$0xff]  }
  0x5a   : > { %v2311_v37 = vunpack.c.l.b16 %v2837_v31 }
  0x5b   : > { %1604 = vmatpush.bf16.msra.mxu3 %v2293_v32  ;;  %1653 = vmatpush.bf16.msra.mxu0 %v2301_v34  ;;  %v2307_v34 = vunpack.c.l.b16 %v2824_v18  ;;  %v2847_v36 = vsel %vm519_vm0, %v582_v27, %v632_v28 }
  0x5c   : > { %1320 = vmatmul.bf16.gmra.mxu1 %v539_v12  ;;  %1369 = vmatmul.bf16.gmra.mxu2 %v2703_v29  ;;  %v608_v12 = vrot.slane %v2542_v21, 1 }
  0x5d   : > { %1556 = vmatpush.bf16.msra.mxu2 %v2284_v45  ;;  %1507 = vmatpush.bf16.msra.mxu1 %v2276_v47  ;;  %v518_v38 = vpack.c.b16 %v2307_v34, %v2307_v34  ;;  %v2859_v45 = vpack.c.b16 %v2311_v37, %v2311_v37 }
  0x5e   : > { %1418 = vmatmul.bf16.gmra.mxu3 %v2538_v19  ;;  %1467 = vmatmul.bf16.gmra.mxu0 %v2706_v30  ;;  %v2809_v2 = vsel %vm596_vm1, %v606_v63, %v608_v12  ;;  %v2843_v33 = vsel %vm596_vm1, %v608_v12, %v2835_v26 }
  0x5f   : > { %1605 = vmatpush.bf16.msra.mxu3 %v2292_v46  ;;  %1654 = vmatpush.bf16.msra.mxu0 %v2300_v48  ;;  %v584_v51 = vshll.u32 %v518_v38, 16 }
  0x61   : > { %1557 = vmatpush.bf16.msra.mxu2 %v2283_v56  ;;  %1508 = vmatpush.bf16.msra.mxu1 %v2275_v58  ;;  %v638_v56 = vshll.u32 %v2859_v45, 16  ;;  %v612_v58 = vrot.slane %v518_v38, 1 }
  0x63   : > { %1606 = vmatpush.bf16.msra.mxu3 %v2291_v57  ;;  %1655 = vmatpush.bf16.msra.mxu0 %v2299_v59  ;;  %v586_v57 = vrot.slane %v584_v51, 1  ;;  %v2871_v59 = vor.u32 %v634_v53, %v632_v28  ;;  %v640_v60 = vrot.slane %v638_v56, 1 }
  0x65   : > { %1558 = vmatpush.bf16.msra.mxu2 %v2282_v6  ;;  %1509 = vmatpush.bf16.msra.mxu1 %v2274_v8  ;;  %v587_v5 = vsel %vm519_vm0, %v582_v27, %v586_v57  ;;  %v613_v6 = vsel %vm596_vm1, %v2835_v26, %v612_v58  ;;  %v641_v8 = vsel %vm519_vm0, %v2871_v59, %v640_v60 }
  0x67   : > { %1607 = vmatpush.bf16.msra.mxu3 %v2290_v7  ;;  %1656 = vmatpush.bf16.msra.mxu0 %v2298_v11 }
  0x69   : > { %1559 = vmatpush.bf16.msra.mxu2 %v2281_v16  ;;  %1510 = vmatpush.bf16.msra.mxu1 %v2273_v22 }
  0x6b   : > { %1608 = vmatpush.bf16.msra.mxu3 %v2289_v17  ;;  %1657 = vmatpush.bf16.msra.mxu0 %v2297_v25 }
  0x6c   : > { %1325 = vmatmul.bf16.gmra.mxu1 %v2706_v30  ;;  %1374 = vmatmul.bf16.gmra.mxu2 %v2727_v43 }
  0x6e   : > { %1423 = vmatmul.bf16.gmra.mxu3 %v2598_v39  ;;  %1472 = vmatmul.bf16.gmra.mxu0 %v2730_v44 }
  0x7c   : > { %1330 = vmatmul.bf16.gmra.mxu1 %v2730_v44  ;;  %1379 = vmatmul.bf16.gmra.mxu2 %v2752_v54 }
  0x7e   : > { %1428 = vmatmul.bf16.gmra.mxu3 %v2540_v20  ;;  %1477 = vmatmul.bf16.gmra.mxu0 %v2755_v55 }
  0x8c   : > { %1335 = vmatmul.bf16.gmra.mxu1 %v2755_v55  ;;  %1384 = vmatmul.bf16.gmra.mxu2 %v2779_v3 }
  0x8e   : > { %1433 = vmatmul.bf16.gmra.mxu3 %v2600_v40  ;;  %1482 = vmatmul.bf16.gmra.mxu0 %v2785_v4 }
  0x9c   : > { %1340 = vmatmul.bf16.gmra.mxu1 %v2785_v4  ;;  %1389 = vmatmul.bf16.gmra.mxu2 %v2809_v2 }
  0x9e   : > { %1438 = vmatmul.bf16.gmra.mxu3 %v2542_v21  ;;  %1487 = vmatmul.bf16.gmra.mxu0 %v2812_v15 }
  0xa9   : > { %v2839_v32 = vpop.f32.mrf.mxu1 }
  0xab   : > { %v1267_v35 = vpop.f32.mrf.mxu0 }
  0xac   : > { %1345 = vmatmul.bf16.gmra.mxu1 %v2812_v15  ;;  %1394 = vmatmul.bf16.gmra.mxu2 %v2843_v33  ;;  %v1268_v17 = vadd.f32 %v2857_v42, %v1267_v35 }
  0xae   : > { %1443 = vmatmul.bf16.gmra.mxu3 %v2602_v41  ;;  %1492 = vmatmul.bf16.gmra.mxu0 %v2847_v36 }
  0xaf   : > { %v1287_v46 = vpop.f32.mrf.mxu2 }
  0xb0   : > { %v2862_v47 = vadd.f32 %v2857_v42, %v1287_v46 }
  0xb1   : > { %v1297_v48 = vpop.f32.mrf.mxu3  ;;  %v2867_v50 = vpop.f32.mrf.mxu1 }
  0xb2   : > { %v2865_v49 = vadd.f32 %v2857_v42, %v1297_v48 }
  0xb3   : > { %v1269_v52 = vpop.f32.mrf.mxu0 }
  0xb4   : > { %v1270_v35 = vadd.f32 %v2857_v42, %v1269_v52 }
  0xb7   : > { %v1289_v61 = vpop.f32.mrf.mxu2 }
  0xb8   : > { %v2874_v62 = vadd.f32 %v2857_v42, %v1289_v61 }
  0xb9   : > { %v1299_v63 = vpop.f32.mrf.mxu3  ;;  %v2879_v1 = vpop.f32.mrf.mxu1 }
  0xba   : > { %v2877_v0 = vadd.f32 %v2857_v42, %v1299_v63 }
  0xbb   : > { %v1272_v7 = vpop.f32.mrf.mxu0 }
  0xbc   : > { %1350 = vmatmul.bf16.gmra.mxu1 %v587_v5  ;;  %1399 = vmatmul.bf16.gmra.mxu2 %v613_v6 }
  0xbe   : > { %1448 = vmatmul.bf16.gmra.mxu3 %v2824_v18  ;;  %1497 = vmatmul.bf16.gmra.mxu0 %v641_v8 }
  0xbf   : > { %v1292_v9 = vpop.f32.mrf.mxu2 }
  0xc0   : > { %v2888_v10 = vadd.f32 %v2857_v42, %v1292_v9 }
  0xc1   : > { %v1302_v11 = vpop.f32.mrf.mxu3  ;;  %v2893_v13 = vpop.f32.mrf.mxu1 }
  0xc2   : > { %v2891_v12 = vadd.f32 %v2857_v42, %v1302_v11 }
  0xc3   : > { %v1274_v14 = vpop.f32.mrf.mxu0 }
  0xc4   : > { %v1275_v6 = vadd.f32 %v2857_v42, %v1274_v14 }
  0xc7   : > { %v1294_v16 = vpop.f32.mrf.mxu2 }
  0xc8   : > { %v2897_v22 = vadd.f32 %v2857_v42, %v1294_v16 }
  0xc9   : > { %v1304_v23 = vpop.f32.mrf.mxu3  ;;  %v1316_v25 = vpop.f32.mrf.mxu1 }
  0xca   : > { %v2900_v24 = vadd.f32 %v2857_v42, %v1304_v23  ;;  %v1317_v27 = vadd.f32 %v1316_v25, %v1268_v17 }
  0xcb   : > { %v1463_v28 = vpop.f32.mrf.mxu0 }
  0xcc   : > { %1511 = vmatmul.bf16.vlgmr.msra.gmra.mxu1 %v2703_v29  ;;  %1560 = vmatmul.bf16.vlgmr.msra.gmra.mxu2 %v2538_v19  ;;  %v1273_v29 = vadd.f32 %v2857_v42, %v1272_v7 }
  0xce   : > { %1609 = vmatmul.bf16.vlgmr.msra.gmra.mxu3 %v2706_v30  ;;  %1658 = vmatmul.bf16.vlgmr.msra.gmra.mxu0 %v2727_v43 }
  0xcf   : > { %v1365_v34 = vpop.f32.mrf.mxu2 }
  0xd0   : > { %v1366_v37 = vadd.f32 %v1365_v34, %v1317_v27 }
  0xd1   : > { %v1414_v38 = vpop.f32.mrf.mxu3  ;;  %v1318_v46 = vpop.f32.mrf.mxu1 }
  0xd2   : > { %v1415_v48 = vadd.f32 %v1414_v38, %v1366_v37  ;;  %v1319_v51 = vadd.f32 %v1318_v46, %v1270_v35 }
  0xd3   : > { %v1465_v53 = vpop.f32.mrf.mxu0 }
  0xd4   : > { %v2907_v56 = vadd.f32 %v1463_v28, %v1415_v48 }
  0xd7   : > { %v1367_v57 = vpop.f32.mrf.mxu2 }
  0xd8   : > { %v1368_v58 = vadd.f32 %v1367_v57, %v1319_v51 }
  0xd9   : > { %v1416_v19 = vpop.f32.mrf.mxu3  ;;  %v1321_v60 = vpop.f32.mrf.mxu1 }
  0xda   : > { %v1417_v30 = vadd.f32 %v1416_v19, %v1368_v58  ;;  %v1322_v61 = vadd.f32 %v1321_v60, %v1273_v29 }
  0xdb   : > { %v1468_v63 = vpop.f32.mrf.mxu0 }
  0xdc   : > { %1516 = vmatmul.bf16.gmra.mxu1 %v2727_v43  ;;  %1565 = vmatmul.bf16.gmra.mxu2 %v2598_v39  ;;  %v2912_v52 = vadd.f32 %v1465_v53, %v1417_v30  ;;  %v1278_v39 = vadd.f32 %v2857_v42, %v2839_v32  ;;  %v1280_v32 = vadd.f32 %v2857_v42, %v2867_v50 }
  0xde   : > { %1614 = vmatmul.bf16.gmra.mxu3 %v2730_v44  ;;  %1663 = vmatmul.bf16.gmra.mxu0 %v2752_v54 }
  0xdf   : > { %v1370_v5 = vpop.f32.mrf.mxu2 }
  0xe0   : > { %v1371_v7 = vadd.f32 %v1370_v5, %v1322_v61 }
  0xe1   : > { %v1419_v8 = vpop.f32.mrf.mxu3  ;;  %v1323_v9 = vpop.f32.mrf.mxu1 }
  0xe2   : > { %v1420_v11 = vadd.f32 %v1419_v8, %v1371_v7  ;;  %v1324_v16 = vadd.f32 %v1323_v9, %v1275_v6 }
  0xe3   : > { %v1470_v17 = vpop.f32.mrf.mxu0 }
  0xe4   : > { %v2917_v23 = vadd.f32 %v1468_v63, %v1420_v11 }
  0xe7   : > { %v1372_v43 = vpop.f32.mrf.mxu2 }
  0xe8   : > { %v1373_v25 = vadd.f32 %v1372_v43, %v1324_v16 }
  0xe9   : > { %v1421_v27 = vpop.f32.mrf.mxu3  ;;  %v1326_v44 = vpop.f32.mrf.mxu1 }
  0xea   : > { %v1422_v28 = vadd.f32 %v1421_v27, %v1373_v25  ;;  %v1327_v34 = vadd.f32 %v1326_v44, %v1278_v39 }
  0xeb   : > { %v1473_v35 = vpop.f32.mrf.mxu0 }
  0xec   : > { %1521 = vmatmul.bf16.gmra.mxu1 %v2752_v54  ;;  %1570 = vmatmul.bf16.gmra.mxu2 %v2540_v20  ;;  %v2923_v14 = vadd.f32 %v1470_v17, %v1422_v28  ;;  %v1283_v20 = vadd.f32 %v2857_v42, %v2879_v1  ;;  %v1285_v1 = vadd.f32 %v2857_v42, %v2893_v13 }
  0xee   : > { %1619 = vmatmul.bf16.gmra.mxu3 %v2755_v55  ;;  %1668 = vmatmul.bf16.gmra.mxu0 %v2779_v3 }
  0xef   : > { %v1375_v37 = vpop.f32.mrf.mxu2 }
  0xf0   : > { %v1376_v38 = vadd.f32 %v1375_v37, %v1327_v34 }
  0xf1   : > { %v1424_v46 = vpop.f32.mrf.mxu3  ;;  %v1328_v48 = vpop.f32.mrf.mxu1 }
  0xf2   : > { %v1425_v51 = vadd.f32 %v1424_v46, %v1376_v38  ;;  %v1329_v53 = vadd.f32 %v1328_v48, %v1280_v32 }
  0xf3   : > { %v1475_v57 = vpop.f32.mrf.mxu0 }
  0xf4   : > { %v2929_v29 = vadd.f32 %v1473_v35, %v1425_v51 }
  0xf7   : > { %v1377_v54 = vpop.f32.mrf.mxu2 }
  0xf8   : > { %v1378_v58 = vadd.f32 %v1377_v54, %v1329_v53 }
  0xf9   : > { %v1426_v55 = vpop.f32.mrf.mxu3  ;;  %v1331_v19 = vpop.f32.mrf.mxu1 }
  0xfa   : > { %v1427_v60 = vadd.f32 %v1426_v55, %v1378_v58  ;;  %v1332_v30 = vadd.f32 %v1331_v19, %v1283_v20  ;;  %v658_v55 = vshll.u32 %v2837_v31, 16 }
  0xfb   : > { %v1478_v61 = vpop.f32.mrf.mxu0 }
  0xfc   : > { %1526 = vmatmul.bf16.gmra.mxu1 %v2779_v3  ;;  %1575 = vmatmul.bf16.gmra.mxu2 %v2600_v40  ;;  %v2935_v50 = vadd.f32 %v1475_v57, %v1427_v60 }
  0xfe   : > { %1624 = vmatmul.bf16.gmra.mxu3 %v2785_v4  ;;  %1673 = vmatmul.bf16.gmra.mxu0 %v2809_v2 }
  0xff   : > { %v1380_v63 = vpop.f32.mrf.mxu2 }
 0x100   : > { %v1381_v5 = vadd.f32 %v1380_v63, %v1332_v30 }
 0x101   : > { %v1429_v6 = vpop.f32.mrf.mxu3  ;;  %v1333_v7 = vpop.f32.mrf.mxu1 }
 0x102   : > { %v1430_v8 = vadd.f32 %v1429_v6, %v1381_v5  ;;  %v1334_v9 = vadd.f32 %v1333_v7, %v1285_v1 }
 0x103   : > { %v1480_v11 = vpop.f32.mrf.mxu0 }
 0x104   : > { %v2941_v16 = vadd.f32 %v1478_v61, %v1430_v8  ;;  %v467_v61 = vld [vmem:[#allocation2 + $0x50] sm:$0xf] }
 0x107   : > { %v1382_v3 = vpop.f32.mrf.mxu2 }
 0x108   : > { %v1383_v40 = vadd.f32 %v1382_v3, %v1334_v9  ;;  %v655_v9 = vunpack.c.l.b16 %v467_v61 }
 0x109   : > { %v1431_v17 = vpop.f32.mrf.mxu3  ;;  %v1336_v43 = vpop.f32.mrf.mxu1 }
 0x10a   : > { %v1432_v39 = vadd.f32 %v1431_v17, %v1383_v40  ;;  %v1337_v4 = vadd.f32 %v1336_v43, %v2862_v47  ;;  %v656_v3 = vpack.c.b16 %v655_v9, %v655_v9 }
 0x10b   : > { %v1483_v25 = vpop.f32.mrf.mxu0 }
 0x10c   : > { %1531 = vmatmul.bf16.gmra.mxu1 %v2809_v2  ;;  %1580 = vmatmul.bf16.gmra.mxu2 %v2542_v21  ;;  %v2946_v42 = vadd.f32 %v1480_v11, %v1432_v39  ;;  %v644_v2 = vrot.slane %v2824_v18, 1 }
 0x10e   : > { %1629 = vmatmul.bf16.gmra.mxu3 %v2812_v15  ;;  %1678 = vmatmul.bf16.gmra.mxu0 %v2843_v33  ;;  %v645_v53 = vsel %vm596_vm1, %v2835_v26, %v644_v2 }
 0x10f   : > { %v1385_v13 = vpop.f32.mrf.mxu2 }
 0x110   : > { %v1386_v27 = vadd.f32 %v1385_v13, %v1337_v4  ;;  %v666_v13 = vshll.u32 %v656_v3, 16 }
 0x111   : > { %v1434_v44 = vpop.f32.mrf.mxu3  ;;  %v1338_v28 = vpop.f32.mrf.mxu1 }
 0x112   : > { %v1435_v34 = vadd.f32 %v1434_v44, %v1386_v27  ;;  %v1339_v35 = vadd.f32 %v1338_v28, %v2874_v62  ;;  %v668_v28 = vrot.slane %v666_v13, 1 }
 0x113   : > { %v1485_v37 = vpop.f32.mrf.mxu0 }
 0x114   : > { %v2951_v47 = vadd.f32 %v1483_v25, %v1435_v34  ;;  %v662_v25 = vshrl.u32 %v2837_v31, 16  ;;  %v674_v34 = vrot.slane %v656_v3, 1 }
 0x117   : > { %v1387_v32 = vpop.f32.mrf.mxu2 }
 0x118   : > { %v1388_v21 = vadd.f32 %v1387_v32, %v1339_v35 }
 0x119   : > { %v1436_v38 = vpop.f32.mrf.mxu3  ;;  %v1341_v46 = vpop.f32.mrf.mxu1 }
 0x11a   : > { %v1437_v48 = vadd.f32 %v1436_v38, %v1388_v21  ;;  %v1342_v15 = vadd.f32 %v1341_v46, %v2888_v10 }
 0x11b   : > { %v1488_v51 = vpop.f32.mrf.mxu0 }
 0x11c   : > { %1536 = vmatmul.bf16.gmra.mxu1 %v2843_v33  ;;  %1585 = vmatmul.bf16.gmra.mxu2 %v2602_v41  ;;  %v2959_v62 = vadd.f32 %v1485_v37, %v1437_v48  ;;  %v660_v33 = vrot.slane %v658_v55, 1  ;;  %v672_v41 = vrot.slane %v2837_v31, 1 }
 0x11e   : > { %1634 = vmatmul.bf16.gmra.mxu3 %v2847_v36  ;;  %1683 = vmatmul.bf16.gmra.mxu0 %v645_v53  ;;  %v661_v5 = vsel %vm519_vm0, %v2871_v59, %v660_v33  ;;  %v664_v44 = vor.u32 %v662_v25, %v660_v33 }
 0x11f   : > { %v1390_v57 = vpop.f32.mrf.mxu2 }
 0x120   : > { %v1391_v54 = vadd.f32 %v1390_v57, %v1342_v15  ;;  %v669_v15 = vsel %vm519_vm0, %v664_v44, %v668_v28 }
 0x121   : > { %v1439_v20 = vpop.f32.mrf.mxu3  ;;  %v1343_v58 = vpop.f32.mrf.mxu1 }
 0x122   : > { %v1440_v10 = vadd.f32 %v1439_v20, %v1391_v54  ;;  %v1344_v19 = vadd.f32 %v1343_v58, %v2897_v22  ;;  %v673_v22 = vsel %vm596_vm1, %v644_v2, %v672_v41 }
 0x123   : > { %v1490_v60 = vpop.f32.mrf.mxu0 }
 0x124   : > { %v2964_v26 = vadd.f32 %v1488_v51, %v1440_v10  ;;  %v675_v51 = vsel %vm596_vm1, %v672_v41, %v674_v34 }
 0x127   : > { %v1392_v30 = vpop.f32.mrf.mxu2 }
 0x128   : > { %v1393_v63 = vadd.f32 %v1392_v30, %v1344_v19 }
 0x129   : > { %v1441_v36 = vpop.f32.mrf.mxu3  ;;  %v1346_v1 = vpop.f32.mrf.mxu1 }
 0x12a   : > { %v1442_v6 = vadd.f32 %v1441_v36, %v1393_v63  ;;  %v1347_v7 = vadd.f32 %v1346_v1, %v2865_v49 }
 0x12b   : > { %v1493_v8 = vpop.f32.mrf.mxu0 }
 0x12c   : > { %1541 = vmatmul.bf16.gmra.mxu1 %v645_v53  ;;  %1590 = vmatmul.bf16.gmra.mxu2 %v2824_v18  ;;  %v2972_v11 = vadd.f32 %v1490_v60, %v1442_v6  ;;  %v646_v18 = vrot.slane %v2859_v45, 1 }
 0x12e   : > { %1639 = vmatmul.bf16.gmra.mxu3 %v661_v5  ;;  %1688 = vmatmul.bf16.gmra.mxu0 %v673_v22  ;;  %v647_v38 = vsel %vm596_vm1, %v644_v2, %v646_v18 }
 0x12f   : > { %v1395_v40 = vpop.f32.mrf.mxu2 }
 0x130   : > { %v1396_v17 = vadd.f32 %v1395_v40, %v1347_v7 }
 0x131   : > { %v1444_v43 = vpop.f32.mrf.mxu3  ;;  %v1348_v39 = vpop.f32.mrf.mxu1 }
 0x132   : > { %v1445_v59 = vadd.f32 %v1444_v43, %v1396_v17  ;;  %v1349_v4 = vadd.f32 %v1348_v39, %v2877_v0 }
 0x133   : > { %v1495_v49 = vpop.f32.mrf.mxu0 }
 0x134   : > { %v2976_v27 = vadd.f32 %v1493_v8, %v1445_v59 }
 0x137   : > { %v1397_v35 = vpop.f32.mrf.mxu2 }
 0x138   : > { %v1398_v37 = vadd.f32 %v1397_v35, %v1349_v4 }
 0x139   : > { %v1446_v32 = vpop.f32.mrf.mxu3  ;;  %v1351_v21 = vpop.f32.mrf.mxu1 }
 0x13a   : > { %v1447_v46 = vadd.f32 %v1446_v32, %v1398_v37  ;;  %v1352_v0 = vadd.f32 %v1351_v21, %v2891_v12 }
 0x13b   : > { %v1498_v48 = vpop.f32.mrf.mxu0 }
 0x13c   : > { %1546 = vmatmul.bf16.gmra.mxu1 %v647_v38  ;;  %1595 = vmatmul.bf16.gmra.mxu2 %v2837_v31  ;;  %v2984_v45 = vadd.f32 %v1495_v49, %v1447_v46 }
 0x13e   : > { %1644 = vmatmul.bf16.gmra.mxu3 %v669_v15  ;;  %1693 = vmatmul.bf16.gmra.mxu0 %v675_v51 }
 0x13f   : > { %v1400_v53 = vpop.f32.mrf.mxu2 }
 0x140   : > { %v1401_v57 = vadd.f32 %v1400_v53, %v1352_v0 }
 0x141   : > { %v1449_v54 = vpop.f32.mrf.mxu3  ;;  %v1353_v20 = vpop.f32.mrf.mxu1 }
 0x142   : > { %v1450_v2 = vadd.f32 %v1449_v54, %v1401_v57  ;;  %v1354_v58 = vadd.f32 %v1353_v20, %v2900_v24 }
 0x143   : > { %v1500_v12 = vpop.f32.mrf.mxu0 }
 0x144   : > { %v2987_v55 = vadd.f32 %v1498_v48, %v1450_v2 }
 0x147   : > { %v1402_v10 = vpop.f32.mrf.mxu2 }
 0x148   : > { %v1403_v19 = vadd.f32 %v1402_v10, %v1354_v58 }
 0x149   : > { %v1451_v60 = vpop.f32.mrf.mxu3  ;;  %v1512_v33 = vpop.f32.mrf.mxu1 }
 0x14a   : > { %v1452_v41 = vadd.f32 %v1451_v60, %v1403_v19  ;;  %v1513_v63 = vadd.f32 %v1512_v33, %v2907_v56 }
 0x14b   : > { %v1659_v31 = vpop.f32.mrf.mxu0 }
 0x14c   : > { %v2989_v30 = vadd.f32 %v1500_v12, %v1452_v41 }
 0x14f   : > { %v1561_v61 = vpop.f32.mrf.mxu2 }
 0x150   : > { %v1562_v5 = vadd.f32 %v1561_v61, %v1513_v63 }
 0x151   : > { %v1610_v36 = vpop.f32.mrf.mxu3  ;;  %v1514_v1 = vpop.f32.mrf.mxu1 }
 0x152   : > { %v1611_v24 = vadd.f32 %v1610_v36, %v1562_v5  ;;  %v1515_v7 = vadd.f32 %v1514_v1, %v2912_v52 }
 0x153   : > { %v1661_v6 = vpop.f32.mrf.mxu0 }
 0x154   : > { %v1660_v40 = vadd.f32 %v1659_v31, %v1611_v24 }
 0x156   : > { %v1699_v59 = vmax.f32 %v1660_v40, 0.0 }
 0x157   : > { %v1563_v8 = vpop.f32.mrf.mxu2 }
 0x158   : > { %v1564_v22 = vadd.f32 %v1563_v8, %v1515_v7 }
 0x159   : > { %v1612_v9 = vpop.f32.mrf.mxu3  ;;  %v1517_v3 = vpop.f32.mrf.mxu1 }
 0x15a   : > { %v1613_v17 = vadd.f32 %v1612_v9, %v1564_v22  ;;  %v1518_v52 = vadd.f32 %v1517_v3, %v2917_v23 }
 0x15b   : > { %v1664_v43 = vpop.f32.mrf.mxu0 }
 0x15c   : > { %v1662_v39 = vadd.f32 %v1661_v6, %v1613_v17 }
 0x15e   : > { %v1700_v4 = vmax.f32 %v1662_v39, 0.0 }
 0x15f   : > { %v1566_v56 = vpop.f32.mrf.mxu2 }
 0x160   : > { %v2316_v49 = vpack.c.bf16 %v1700_v4, %v1699_v59  ;;  %v1567_v18 = vadd.f32 %v1566_v56, %v1518_v52 }
 0x161   : > { %v1615_v25 = vpop.f32.mrf.mxu3  ;;  %v1519_v13 = vpop.f32.mrf.mxu1 }
 0x162   : > { %2317 = vst [vmem:[%s2997_s15] sm:$0xff] %v2316_v49   ;;  %v1616_v28 = vadd.f32 %v1615_v25, %v1567_v18  ;;  %v1520_v34 = vadd.f32 %v1519_v13, %v2923_v14 }
 0x163   : > { %v1666_v44 = vpop.f32.mrf.mxu0 }
 0x164   : > { %v1665_v38 = vadd.f32 %v1664_v43, %v1616_v28 }
 0x166   : > { %v1701_v15 = vmax.f32 %v1665_v38, 0.0 }
 0x167   : > { %v1568_v35 = vpop.f32.mrf.mxu2 }
 0x168   : > { %v1569_v37 = vadd.f32 %v1568_v35, %v1520_v34 }
 0x169   : > { %v1617_v32 = vpop.f32.mrf.mxu3  ;;  %v1522_v21 = vpop.f32.mrf.mxu1 }
 0x16a   : > { %v1618_v46 = vadd.f32 %v1617_v32, %v1569_v37  ;;  %v1523_v57 = vadd.f32 %v1522_v21, %v2929_v29 }
 0x16b   : > { %v1669_v0 = vpop.f32.mrf.mxu0 }
 0x16c   : > { %v1667_v48 = vadd.f32 %v1666_v44, %v1618_v46 }
 0x16e   : > { %v1702_v51 = vmax.f32 %v1667_v48, 0.0 }
 0x16f   : > { %v1571_v23 = vpop.f32.mrf.mxu2 }
 0x170   : > { %v2321_v53 = vpack.c.bf16 %v1702_v51, %v1701_v15  ;;  %v1572_v2 = vadd.f32 %v1571_v23, %v1523_v57 }
 0x171   : > { %v1620_v54 = vpop.f32.mrf.mxu3  ;;  %v1524_v20 = vpop.f32.mrf.mxu1 }
 0x172   : > { %2356 = vst [vmem:[%s2997_s15 + $0x8] sm:$0xff] %v2321_v53   ;;  %v1621_v58 = vadd.f32 %v1620_v54, %v1572_v2  ;;  %v1525_v12 = vadd.f32 %v1524_v20, %v2935_v50 }
 0x173   : > { %v1671_v14 = vpop.f32.mrf.mxu0 }
 0x174   : > { %v1670_v41 = vadd.f32 %v1669_v0, %v1621_v58 }
 0x176   : > { %v1703_v36 = vmax.f32 %v1670_v41, 0.0 }
 0x177   : > { %v1573_v10 = vpop.f32.mrf.mxu2 }
 0x178   : > { %v1574_v19 = vadd.f32 %v1573_v10, %v1525_v12 }
 0x179   : > { %v1622_v60 = vpop.f32.mrf.mxu3  ;;  %v1527_v33 = vpop.f32.mrf.mxu1 }
 0x17a   : > { %v1623_v31 = vadd.f32 %v1622_v60, %v1574_v19  ;;  %v1528_v6 = vadd.f32 %v1527_v33, %v2941_v16 }
 0x17b   : > { %v1674_v61 = vpop.f32.mrf.mxu0 }
 0x17c   : > { %v1672_v63 = vadd.f32 %v1671_v14, %v1623_v31 }
 0x17e   : > { %v1704_v1 = vmax.f32 %v1672_v63, 0.0 }
 0x17f   : > { %v1576_v29 = vpop.f32.mrf.mxu2 }
 0x180   : > { %v2326_v5 = vpack.c.bf16 %v1704_v1, %v1703_v36  ;;  %v1577_v8 = vadd.f32 %v1576_v29, %v1528_v6 }
 0x181   : > { %v1625_v24 = vpop.f32.mrf.mxu3  ;;  %v1529_v7 = vpop.f32.mrf.mxu1 }
 0x182   : > { %2357 = vst [vmem:[%s2997_s15 + $0x10] sm:$0xff] %v2326_v5   ;;  %v1626_v22 = vadd.f32 %v1625_v24, %v1577_v8  ;;  %v1530_v9 = vadd.f32 %v1529_v7, %v2946_v42 }
 0x183   : > { %v1676_v50 = vpop.f32.mrf.mxu0 }
 0x184   : > { %v1675_v39 = vadd.f32 %v1674_v61, %v1626_v22 }
 0x186   : > { %v1705_v49 = vmax.f32 %v1675_v39, 0.0 }
 0x187   : > { %v1578_v3 = vpop.f32.mrf.mxu2 }
 0x188   : > { %v1579_v40 = vadd.f32 %v1578_v3, %v1530_v9 }
 0x189   : > { %v1627_v17 = vpop.f32.mrf.mxu3  ;;  %v1532_v43 = vpop.f32.mrf.mxu1 }
 0x18a   : > { %v1628_v59 = vadd.f32 %v1627_v17, %v1579_v40  ;;  %v1533_v13 = vadd.f32 %v1532_v43, %v2951_v47 }
 0x18b   : > { %v1679_v4 = vpop.f32.mrf.mxu0 }
 0x18c   : > { %v1677_v56 = vadd.f32 %v1676_v50, %v1628_v59 }
 0x18e   : > { %v1706_v52 = vmax.f32 %v1677_v56, 0.0 }
 0x18f   : > { %v1581_v16 = vpop.f32.mrf.mxu2 }
 0x190   : > { %v2331_v25 = vpack.c.bf16 %v1706_v52, %v1705_v49  ;;  %v1582_v28 = vadd.f32 %v1581_v16, %v1533_v13 }
 0x191   : > { %v1630_v18 = vpop.f32.mrf.mxu3  ;;  %v1534_v44 = vpop.f32.mrf.mxu1 }
 0x192   : > { %2358 = vst [vmem:[%s2997_s15 + $0x18] sm:$0xff] %v2331_v25   ;;  %v1631_v34 = vadd.f32 %v1630_v18, %v1582_v28  ;;  %v1535_v35 = vadd.f32 %v1534_v44, %v2959_v62 }
 0x193   : > { %v1681_v42 = vpop.f32.mrf.mxu0 }
 0x194   : > { %v1680_v46 = vadd.f32 %v1679_v4, %v1631_v34 }
 0x196   : > { %v1707_v51 = vmax.f32 %v1680_v46, 0.0 }
 0x197   : > { %v1583_v37 = vpop.f32.mrf.mxu2 }
 0x198   : > { %v1584_v32 = vadd.f32 %v1583_v37, %v1535_v35 }
 0x199   : > { %v1632_v21 = vpop.f32.mrf.mxu3  ;;  %v1537_v38 = vpop.f32.mrf.mxu1 }
 0x19a   : > { %v1633_v0 = vadd.f32 %v1632_v21, %v1584_v32  ;;  %v1538_v57 = vadd.f32 %v1537_v38, %v2964_v26 }
 0x19b   : > { %v1684_v48 = vpop.f32.mrf.mxu0 }
 0x19c   : > { %v1682_v15 = vadd.f32 %v1681_v42, %v1633_v0 }
 0x19e   : > { %v1708_v23 = vmax.f32 %v1682_v15, 0.0 }
 0x19f   : > { %v1586_v47 = vpop.f32.mrf.mxu2 }
 0x1a0   : > { %v2336_v53 = vpack.c.bf16 %v1708_v23, %v1707_v51  ;;  %v1587_v2 = vadd.f32 %v1586_v47, %v1538_v57 }
 0x1a1   : > { %v1635_v54 = vpop.f32.mrf.mxu3  ;;  %v1539_v20 = vpop.f32.mrf.mxu1 }
 0x1a2   : > { %2359 = vst [vmem:[%s2997_s15 + $0x20] sm:$0xff] %v2336_v53   ;;  %v1636_v14 = vadd.f32 %v1635_v54, %v1587_v2  ;;  %v1540_v58 = vadd.f32 %v1539_v20, %v2972_v11 }
 0x1a3   : > { %v1686_v62 = vpop.f32.mrf.mxu0 }
 0x1a4   : > { %v1685_v33 = vadd.f32 %v1684_v48, %v1636_v14 }
 0x1a6   : > { %v1709_v63 = vmax.f32 %v1685_v33, 0.0 }
 0x1a7   : > { %v1588_v12 = vpop.f32.mrf.mxu2 }
 0x1a8   : > { %v1589_v10 = vadd.f32 %v1588_v12, %v1540_v58 }
 0x1a9   : > { %v1637_v19 = vpop.f32.mrf.mxu3  ;;  %v1542_v60 = vpop.f32.mrf.mxu1 }
 0x1aa   : > { %v1638_v41 = vadd.f32 %v1637_v19, %v1589_v10  ;;  %v1543_v29 = vadd.f32 %v1542_v60, %v2976_v27 }
 0x1ab   : > { %v1689_v61 = vpop.f32.mrf.mxu0 }
 0x1ac   : > { %v1687_v31 = vadd.f32 %v1686_v62, %v1638_v41 }
 0x1ae   : > { %v1710_v36 = vmax.f32 %v1687_v31, 0.0 }
 0x1af   : > { %v1591_v26 = vpop.f32.mrf.mxu2 }
 0x1b0   : > { %v2341_v1 = vpack.c.bf16 %v1710_v36, %v1709_v63  ;;  %v1592_v24 = vadd.f32 %v1591_v26, %v1543_v29 }
 0x1b1   : > { %v1640_v5 = vpop.f32.mrf.mxu3  ;;  %v1544_v6 = vpop.f32.mrf.mxu1 }
 0x1b2   : > { %2360 = vst [vmem:[%s2997_s15 + $0x28] sm:$0xff] %v2341_v1   ;;  %v1641_v11 = vadd.f32 %v1640_v5, %v1592_v24  ;;  %v1545_v7 = vadd.f32 %v1544_v6, %v2984_v45 }
 0x1b3   : > { %v1691_v8 = vpop.f32.mrf.mxu0 }
 0x1b4   : > { %v1690_v40 = vadd.f32 %v1689_v61, %v1641_v11 }
 0x1b6   : > { %v1711_v39 = vmax.f32 %v1690_v40, 0.0 }
 0x1b7   : > { %v1593_v50 = vpop.f32.mrf.mxu2 }
 0x1b8   : > { %v1594_v22 = vadd.f32 %v1593_v50, %v1545_v7 }
 0x1b9   : > { %v1642_v9 = vpop.f32.mrf.mxu3  ;;  %v1547_v3 = vpop.f32.mrf.mxu1 }
 0x1ba   : > { %v1643_v17 = vadd.f32 %v1642_v9, %v1594_v22  ;;  %v1548_v56 = vadd.f32 %v1547_v3, %v2987_v55 }
 0x1bb   : > { %v1694_v52 = vpop.f32.mrf.mxu0 }
 0x1bc   : > { %v1692_v43 = vadd.f32 %v1691_v8, %v1643_v17 }
 0x1be   : > { %v1712_v59 = vmax.f32 %v1692_v43, 0.0 }
 0x1bf   : > { %v1596_v4 = vpop.f32.mrf.mxu2 }
 0x1c0   : > { %v2346_v27 = vpack.c.bf16 %v1712_v59, %v1711_v39  ;;  %v1597_v45 = vadd.f32 %v1596_v4, %v1548_v56 }
 0x1c1   : > { %v1645_v49 = vpop.f32.mrf.mxu3  ;;  %v1549_v16 = vpop.f32.mrf.mxu1 }
 0x1c2   : > { %2361 = vst [vmem:[%s2997_s15 + $0x30] sm:$0xff] %v2346_v27   ;;  %v1646_v25 = vadd.f32 %v1645_v49, %v1597_v45  ;;  %v1550_v13 = vadd.f32 %v1549_v16, %v2989_v30 }
 0x1c3   : > { %v1696_v35 = vpop.f32.mrf.mxu0 }
 0x1c4   : > { %v1695_v42 = vadd.f32 %v1694_v52, %v1646_v25 }
 0x1c6   : > { %v1713_v32 = vmax.f32 %v1695_v42, 0.0 }
 0x1c7   : > { %v1598_v18 = vpop.f32.mrf.mxu2 }
 0x1c8   : > { %v1599_v44 = vadd.f32 %v1598_v18, %v1550_v13 }
 0x1c9   : > { %v1647_v28 = vpop.f32.mrf.mxu3 }
 0x1ca   : > { %v1648_v34 = vadd.f32 %v1647_v28, %v1599_v44 }
 0x1cc   : > { %v1697_v37 = vadd.f32 %v1696_v35, %v1648_v34 }
 0x1ce   : > { %v1714_v21 = vmax.f32 %v1697_v37, 0.0 }
 0x1d0   : > { %v2351_v38 = vpack.c.bf16 %v1714_v21, %v1713_v32 }
 0x1d2   : > { %2362 = vst [vmem:[%s2997_s15 + $0x38] sm:$0xff] %v2351_v38  }
 0x1d3 PF: > { %s15_s20 = sadd.s32 1, %s2435_s20   ;;  %s3036_s18 = smov %s2431_s19 }
 0x1d4   : > { %p12_p5 = scmp.ge.s32.totalorder %s15_s20, 4   ;;  %s3037_s19 = smov %s3039_s21 }
 0x1d6   :  { %14 = sbr.rel (!%p12_p5) target bundleno = 2 (0x2), region = 84 }

// kernel: down_block_forward.2
= control target key start
LH: loop header
LB: loop body
LE: loop exit
PB: predicated region body
PF: predicated region fallthrough
CT: control target
= control target key end

     0   :  { %s2827_s15 = smov 0   ;;  %s2829_s16 = smov 0   ;;  %s3457_s0 = inlined_call_operand.vmem [shape: bf16[2,20,16,256], index: 0, kind: input, shape index: {}, may-alias: {0,1}]   ;;  %s3458_s1 = inlined_call_operand.vmem [shape: bf16[2,20,16,256], index: 1, kind: input, shape index: {}, may-alias: {0,1}]   ;;  %s3459_s2 = inlined_call_operand.vmem [shape: bf16[1152,128], index: 2, kind: input, shape index: {}]   ;;  %s3460_s3 = inlined_call_operand.vmem [shape: f32[1,128], index: 3, kind: input, shape index: {}]   ;;  %s3461_s4 = inlined_call_operand.vmem [shape: bf16[2,8,16,128], index: 4, kind: output, shape index: {}]  }
   0x1   :  { %s2831_s17 = smov 0  }
   0x2 LB: > { %s26_s18 = sadd.s32 1, %s2795_s16  ;;  %p2198_p0 = scmp.ge.s32.totalorder %s2799_s17, 1  ;;  %s2799_s17 = sphi %s2831_s17, %s14_s17   ;;  %s2795_s16 = sphi %s2829_s16, %s3463_s16   ;;  %s2791_s15 = sphi %s2827_s15, %s3462_s15  }
   0x3   : > { %p28_p1 = scmp.ge.s32.totalorder %s26_s18, 2  ;;  %p222_p2 = scmp.lt.s32.totalorder %s2799_s17, 3 }
   0x5   : > { %s3465_s18 = smov (%p28_p1, %s26_s18), 0  ;;  %p223_p3 = pnand %p2198_p0, %p222_p2 }
   0x6   : > { %p283_p4 = scmp.lt.s32.totalorder (!%p223_p3), %s2791_s15, 1 }
   0x7   : > { %226 = sbr.rel (%p223_p3) target bundleno = 470 (0x1d6), region = 36 }
   0xc   : > { %v2543_v0 = vld [vmem:[%s3459_s2 + $0x38] sm:$0xff]  ;;  %v2542_v1 = vld [vmem:[%s3459_s2 + $0x30] sm:$0xff]  ;;  %s3467_s15 = smov (!%p283_p4, %s2791_s15), 1  ;;  %v2541_v2 = vld [vmem:[%s3459_s2 + $0x28] sm:$0xff]  ;;  %vm820_vm0 = vsmask.f32 7424 }
   0xd   : > { %2724 = vmatpush.bf16.msra.mxu1 %v2543_v0  ;;  %2725 = vmatpush.bf16.msra.mxu2 %v2543_v0  ;;  %s2748_s23 = smul.u32 320, %s3467_s15  ;;  %v2540_v18 = vld [vmem:[%s3459_s2 + $0x20] sm:$0xff]  ;;  %v2539_v37 = vld [vmem:[%s3459_s2 + $0x18] sm:$0xff]  ;;  %v2538_v57 = vld [vmem:[%s3459_s2 + $0x10] sm:$0xff]  ;;  %vm897_vm1 = vcmask 1046528  }
   0xe   : > { %2726 = vmatpush.bf16.msra.mxu3 %v2543_v0  ;;  %1559 = vmatpush.bf16.msra.mxu0 %v2543_v0 }
   0xf   : > { %s2862_s28 = scalar_lea.vmem %s3457_s0, %s2748_s23  ;;  %s2526_s19 = sadd.s32 256, %s2748_s23 }
  0x10   : > { %v334_v3 = vld [vmem:[%s2862_s28 + $0x40] sm:$0xff]  ;;  %v335_v4 = vld [vmem:[%s2862_s28 + $0x48] sm:$0xff]  ;;  %v336_v5 = vld [vmem:[%s2862_s28 + $0x50] sm:$0xff]  ;;  %s3145_s22 = scalar_lea.vmem %s3458_s1, %s2526_s19  ;;  %s2527_s23 = sshll.u32 %s3467_s15, 6 }
  0x11   : > { %2727 = vmatpush.bf16.msra.mxu1 %v2542_v1  ;;  %2728 = vmatpush.bf16.msra.mxu2 %v2542_v1  ;;  %v337_v6 = vld [vmem:[%s2862_s28 + $0x58] sm:$0xff]  ;;  %v366_v7 = vunpack.c.l.bf16 %v334_v3  ;;  %v367_v8 = vunpack.c.l.bf16 %v335_v4  ;;  %v368_v9 = vunpack.c.l.bf16 %v336_v5  ;;  %v430_v10 = vrot.slane %v334_v3, 4  ;;  %v342_v15 = vld [vmem:[%s2862_s28 + $0x80] sm:$0xff]  ;;  %v343_v16 = vld [vmem:[%s2862_s28 + $0x88] sm:$0xff]  ;;  %s3395_s27 = scalar_lea.vmem %s3461_s4, %s2527_s23 }
  0x12   : > { %2729 = vmatpush.bf16.msra.mxu3 %v2542_v1  ;;  %1560 = vmatpush.bf16.msra.mxu0 %v2542_v1  ;;  %v369_v11 = vunpack.c.l.bf16 %v337_v6  ;;  %v431_v12 = vrot.slane %v335_v4, 4  ;;  %v432_v13 = vrot.slane %v336_v5, 4  ;;  %v433_v14 = vrot.slane %v337_v6, 4  ;;  %v344_v17 = vld [vmem:[%s2862_s28 + $0x90] sm:$0xff]  ;;  %v345_v20 = vld [vmem:[%s2862_s28 + $0x98] sm:$0xff]  ;;  %v350_v36 = vld [vmem:[%s2862_s28 + $0xc0] sm:$0xff] }
  0x13   : > { %v494_v19 = vunpack.c.l.bf16 %v430_v10  ;;  %v374_v21 = vunpack.c.l.bf16 %v342_v15  ;;  %v375_v22 = vunpack.c.l.bf16 %v343_v16  ;;  %v376_v23 = vunpack.c.l.bf16 %v344_v17  ;;  %v351_v41 = vld [vmem:[%s2862_s28 + $0xc8] sm:$0xff]  ;;  %v352_v46 = vld [vmem:[%s2862_s28 + $0xd0] sm:$0xff]  ;;  %v353_v47 = vld [vmem:[%s2862_s28 + $0xd8] sm:$0xff] }
  0x14   : > { %v495_v24 = vunpack.c.l.bf16 %v431_v12  ;;  %v496_v25 = vunpack.c.l.bf16 %v432_v13  ;;  %v497_v26 = vunpack.c.l.bf16 %v433_v14  ;;  %v377_v27 = vunpack.c.l.bf16 %v345_v20  ;;  %v326_v62 = vld [vmem:[%s2862_s28] sm:$0xff]  ;;  %v327_v63 = vld [vmem:[%s2862_s28 + $0x8] sm:$0xff] }
  0x15   : > { %2730 = vmatpush.bf16.msra.mxu1 %v2541_v2  ;;  %2731 = vmatpush.bf16.msra.mxu2 %v2541_v2  ;;  %v526_v28 = vmax.f32 %v366_v7, %v494_v19  ;;  %v438_v29 = vrot.slane %v342_v15, 4  ;;  %v439_v30 = vrot.slane %v343_v16, 4  ;;  %v440_v31 = vrot.slane %v344_v17, 4  ;;  %v2537_v14 = vld [vmem:[%s3459_s2 + $0x8] sm:$0xff]  ;;  %v338_v19 = vld [vmem:[%s2862_s28 + $0x60] sm:$0xff] }
  0x16   : > { %2732 = vmatpush.bf16.msra.mxu3 %v2541_v2  ;;  %1561 = vmatpush.bf16.msra.mxu0 %v2541_v2  ;;  %v527_v32 = vmax.f32 %v367_v8, %v495_v24  ;;  %v528_v33 = vmax.f32 %v368_v9, %v496_v25  ;;  %v529_v34 = vmax.f32 %v369_v11, %v497_v26  ;;  %v441_v35 = vrot.slane %v345_v20, 4  ;;  %v328_v2 = vld [vmem:[%s2862_s28 + $0x10] sm:$0xff]  ;;  %v329_v8 = vld [vmem:[%s2862_s28 + $0x18] sm:$0xff] }
  0x17   : > { %v502_v38 = vunpack.c.l.bf16 %v438_v29  ;;  %v503_v39 = vunpack.c.l.bf16 %v439_v30  ;;  %v504_v40 = vunpack.c.l.bf16 %v440_v31  ;;  %v382_v42 = vunpack.c.l.bf16 %v350_v36 }
  0x18   : > { %v618_v43 = vmax.f32 %v526_v28, %v528_v33  ;;  %v619_v44 = vmax.f32 %v527_v32, %v529_v34  ;;  %v505_v45 = vunpack.c.l.bf16 %v441_v35  ;;  %v383_v48 = vunpack.c.l.bf16 %v351_v41  ;;  %v340_v28 = vld [vmem:[%s2862_s28 + $0x70] sm:$0xff]  ;;  %v341_v33 = vld [vmem:[%s2862_s28 + $0x78] sm:$0xff]  ;;  %v2536_v35 = vld [vmem:[%s3459_s2] sm:$0xff] }
  0x19   : > { %2733 = vmatpush.bf16.msra.mxu1 %v2540_v18  ;;  %2734 = vmatpush.bf16.msra.mxu2 %v2540_v18  ;;  %v534_v49 = vmax.f32 %v374_v21, %v502_v38  ;;  %v535_v50 = vmax.f32 %v375_v22, %v503_v39  ;;  %v536_v51 = vmax.f32 %v376_v23, %v504_v40  ;;  %v384_v52 = vunpack.c.l.bf16 %v352_v46  ;;  %v339_v23 = vld [vmem:[%s2862_s28 + $0x68] sm:$0xff] }
  0x1a   : > { %2735 = vmatpush.bf16.msra.mxu3 %v2540_v18  ;;  %1562 = vmatpush.bf16.msra.mxu0 %v2540_v18  ;;  %v2621_v53 = vpack.c.bf16 %v619_v44, %v618_v43  ;;  %v537_v54 = vmax.f32 %v377_v27, %v505_v45  ;;  %v385_v55 = vunpack.c.l.bf16 %v353_v47  ;;  %v446_v56 = vrot.slane %v350_v36, 4  ;;  %v346_v44 = vld [vmem:[%s2862_s28 + $0xa0] sm:$0xff]  ;;  %v2901_v45 = vld [vmem:[%s2862_s28 + $0xa8] sm:$0xff] }
  0x1b   : > { %v622_v58 = vmax.f32 %v534_v49, %v536_v51  ;;  %v447_v59 = vrot.slane %v351_v41, 4  ;;  %v448_v60 = vrot.slane %v352_v46, 4  ;;  %v449_v61 = vrot.slane %v353_v47, 4  ;;  %v2559_v46 = vld [vmem:[%s3459_s2 + $0xb8] sm:$0xff] }
  0x1c   : > { %2707 = vst [vmem:[#allocation2 + $0x10] sm:$0xff] %v2621_v53   ;;  %v623_v0 = vmax.f32 %v535_v50, %v537_v54  ;;  %v510_v1 = vunpack.c.l.bf16 %v446_v56  ;;  %v358_v3 = vunpack.c.l.bf16 %v326_v62  ;;  %v359_v4 = vunpack.c.l.bf16 %v327_v63  ;;  %v2551_v47 = vld [vmem:[%s3459_s2 + $0x78] sm:$0xff] }
  0x1d   : > { %2736 = vmatpush.bf16.msra.mxu1 %v2539_v37  ;;  %2737 = vmatpush.bf16.msra.mxu2 %v2539_v37  ;;  %v511_v5 = vunpack.c.l.bf16 %v447_v59  ;;  %v512_v6 = vunpack.c.l.bf16 %v448_v60  ;;  %v513_v7 = vunpack.c.l.bf16 %v449_v61  ;;  %v360_v9 = vunpack.c.l.bf16 %v328_v2  ;;  %v2567_v60 = vld [vmem:[%s3459_s2 + $0xf8] sm:$0xff] }
  0x1e   : > { %2738 = vmatpush.bf16.msra.mxu3 %v2539_v37  ;;  %1563 = vmatpush.bf16.msra.mxu0 %v2539_v37  ;;  %v2631_v10 = vpack.c.bf16 %v623_v0, %v622_v58  ;;  %v542_v11 = vmax.f32 %v382_v42, %v510_v1  ;;  %v361_v12 = vunpack.c.l.bf16 %v329_v8  ;;  %v422_v13 = vrot.slane %v326_v62, 4  ;;  %v349_v58 = vld [vmem:[%s2862_s28 + $0xb8] sm:$0xff] }
  0x1f   : > { %v543_v15 = vmax.f32 %v383_v48, %v511_v5  ;;  %v544_v16 = vmax.f32 %v384_v52, %v512_v6  ;;  %v545_v17 = vmax.f32 %v385_v55, %v513_v7  ;;  %v423_v18 = vrot.slane %v327_v63, 4  ;;  %v2575_v61 = vld [vmem:[%s3459_s2 + $0x138] sm:$0xff]  ;;  %v2550_v7 = vld [vmem:[%s3459_s2 + $0x70] sm:$0xff] }
  0x20   : > { %2709 = vst [vmem:[#allocation2 + $0x20] sm:$0xff] %v2631_v10   ;;  %v424_v20 = vrot.slane %v328_v2, 4  ;;  %v425_v21 = vrot.slane %v329_v8, 4  ;;  %v486_v22 = vunpack.c.l.bf16 %v422_v13  ;;  %v370_v24 = vunpack.c.l.bf16 %v338_v19  ;;  %v355_v13 = vld [vmem:[%s2862_s28 + $0xe8] sm:$0xff] }
  0x21   : > { %2739 = vmatpush.bf16.msra.mxu1 %v2538_v57  ;;  %2740 = vmatpush.bf16.msra.mxu2 %v2538_v57  ;;  %v626_v25 = vmax.f32 %v542_v11, %v544_v16  ;;  %v627_v26 = vmax.f32 %v543_v15, %v545_v17  ;;  %v487_v27 = vunpack.c.l.bf16 %v423_v18  ;;  %v371_v29 = vunpack.c.l.bf16 %v339_v23 }
  0x22   : > { %2741 = vmatpush.bf16.msra.mxu3 %v2538_v57  ;;  %1564 = vmatpush.bf16.msra.mxu0 %v2538_v57  ;;  %v488_v30 = vunpack.c.l.bf16 %v424_v20  ;;  %v489_v31 = vunpack.c.l.bf16 %v425_v21  ;;  %v518_v32 = vmax.f32 %v358_v3, %v486_v22  ;;  %v372_v34 = vunpack.c.l.bf16 %v340_v28  ;;  %v348_v57 = vld [vmem:[%s2862_s28 + $0xb0] sm:$0xff] }
  0x23   : > { %v2641_v36 = vpack.c.bf16 %v627_v26, %v626_v25  ;;  %v519_v37 = vmax.f32 %v359_v4, %v487_v27  ;;  %v373_v38 = vunpack.c.l.bf16 %v341_v33  ;;  %v434_v39 = vrot.slane %v338_v19, 4  ;;  %v2910_v52 = vld [vmem:[#allocation2 + $0x10] sm:$0xff]  ;;  %v357_v25 = vld [vmem:[%s2862_s28 + $0xf8] sm:$0xff] }
  0x24   : > { %v520_v40 = vmax.f32 %v360_v9, %v488_v30  ;;  %v521_v41 = vmax.f32 %v361_v12, %v489_v31  ;;  %v435_v42 = vrot.slane %v339_v23, 4  ;;  %v436_v43 = vrot.slane %v340_v28, 4  ;;  %v2558_v3 = vld [vmem:[%s3459_s2 + $0xb0] sm:$0xff]  ;;  %v354_v12 = vld [vmem:[%s2862_s28 + $0xe0] sm:$0xff]  ;;  %v2557_v31 = vld [vmem:[%s3459_s2 + $0xa8] sm:$0xff] }
  0x25   : > { %2742 = vmatpush.bf16.msra.mxu1 %v2537_v14  ;;  %2743 = vmatpush.bf16.msra.mxu2 %v2537_v14  ;;  %2711 = vst [vmem:[#allocation2 + $0x30] sm:$0xff] %v2641_v36   ;;  %v437_v48 = vrot.slane %v341_v33, 4  ;;  %v498_v49 = vunpack.c.l.bf16 %v434_v39  ;;  %v378_v50 = vunpack.c.l.bf16 %v346_v44  ;;  %v379_v51 = vunpack.c.l.bf16 %v2901_v45  ;;  %v2574_v19 = vld [vmem:[%s3459_s2 + $0x130] sm:$0xff] }
  0x26   : > { %2744 = vmatpush.bf16.msra.mxu3 %v2537_v14  ;;  %1565 = vmatpush.bf16.msra.mxu0 %v2537_v14  ;;  %v614_v53 = vmax.f32 %v518_v32, %v520_v40  ;;  %v615_v54 = vmax.f32 %v519_v37, %v521_v41  ;;  %v499_v55 = vunpack.c.l.bf16 %v435_v42  ;;  %v500_v56 = vunpack.c.l.bf16 %v436_v43  ;;  %v2566_v14 = vld [vmem:[%s3459_s2 + $0xf0] sm:$0xff]  ;;  %v2549_v32 = vld [vmem:[%s3459_s2 + $0x68] sm:$0xff]  ;;  %v330_v41 = vld [vmem:[%s2862_s28 + $0x20] sm:$0xff] }
  0x27   : > { %v2914_v59 = vld [vmem:[#allocation2 + $0x20] sm:$0xff]  ;;  %v501_v62 = vunpack.c.l.bf16 %v437_v48  ;;  %v530_v63 = vmax.f32 %v370_v24, %v498_v49  ;;  %v380_v0 = vunpack.c.l.bf16 %v348_v57  ;;  %v381_v1 = vunpack.c.l.bf16 %v349_v58  ;;  %v356_v24 = vld [vmem:[%s2862_s28 + $0xf0] sm:$0xff]  ;;  %v2565_v42 = vld [vmem:[%s3459_s2 + $0xe8] sm:$0xff] }
  0x28   : > { %v2611_v2 = vpack.c.bf16 %v615_v54, %v614_v53  ;;  %v531_v4 = vmax.f32 %v371_v29, %v499_v55  ;;  %v532_v5 = vmax.f32 %v372_v34, %v500_v56  ;;  %v442_v6 = vrot.slane %v346_v44, 4  ;;  %v332_v53 = vld [vmem:[%s2862_s28 + $0x30] sm:$0xff]  ;;  %v333_v54 = vld [vmem:[%s2862_s28 + $0x38] sm:$0xff]  ;;  %v2556_v56 = vld [vmem:[%s3459_s2 + $0xa0] sm:$0xff] }
  0x29   : > { %2745 = vmatpush.bf16.msra.mxu1 %v2536_v35  ;;  %2746 = vmatpush.bf16.msra.mxu2 %v2536_v35  ;;  %v533_v8 = vmax.f32 %v373_v38, %v501_v62  ;;  %v443_v9 = vrot.slane %v2901_v45, 4  ;;  %v444_v10 = vrot.slane %v348_v57, 4  ;;  %v445_v11 = vrot.slane %v349_v58, 4  ;;  %v331_v45 = vld [vmem:[%s2862_s28 + $0x28] sm:$0xff]  ;;  %v2548_v57 = vld [vmem:[%s3459_s2 + $0x60] sm:$0xff] }
  0x2a   : > { %2747 = vmatpush.bf16.msra.mxu3 %v2536_v35  ;;  %1566 = vmatpush.bf16.msra.mxu0 %v2536_v35  ;;  %2612 = vst [vmem:[#allocation2] sm:$0xff] %v2611_v2   ;;  %v620_v15 = vmax.f32 %v530_v63, %v532_v5  ;;  %v506_v16 = vunpack.c.l.bf16 %v442_v6  ;;  %v386_v17 = vunpack.c.l.bf16 %v354_v12  ;;  %v387_v18 = vunpack.c.l.bf16 %v355_v13 }
  0x2b   : > { %v621_v20 = vmax.f32 %v531_v4, %v533_v8  ;;  %v507_v21 = vunpack.c.l.bf16 %v443_v9  ;;  %v508_v22 = vunpack.c.l.bf16 %v444_v10  ;;  %v509_v23 = vunpack.c.l.bf16 %v445_v11  ;;  %v2572_v8 = vld [vmem:[%s3459_s2 + $0x120] sm:$0xff] }
  0x2c   : > { %1577 = vmatmul.bf16.vlgmr.msra.gmra.mxu1 %v2910_v52  ;;  %1587 = vmatmul.bf16.vlgmr.msra.gmra.mxu2 %v2914_v59  ;;  %v2941_v26 = vld [vmem:[#allocation2 + $0x30] sm:$0xff]  ;;  %v538_v27 = vmax.f32 %v378_v50, %v506_v16  ;;  %v388_v28 = vunpack.c.l.bf16 %v356_v24  ;;  %v389_v29 = vunpack.c.l.bf16 %v357_v25  ;;  %v450_v30 = vrot.slane %v354_v12, 4  ;;  %v2555_v12 = vld [vmem:[%s3459_s2 + $0x98] sm:$0xff] }
  0x2d   : > { %1657 = vmatpush.bf16.msrb.mxu2 %v2559_v46  ;;  %1608 = vmatpush.bf16.msrb.mxu1 %v2551_v47  ;;  %v2626_v33 = vpack.c.bf16 %v621_v20, %v620_v15  ;;  %v539_v34 = vmax.f32 %v379_v51, %v507_v21  ;;  %v540_v35 = vmax.f32 %v380_v0, %v508_v22  ;;  %v451_v36 = vrot.slane %v355_v13, 4  ;;  %v2573_v47 = vld [vmem:[%s3459_s2 + $0x128] sm:$0xff]  ;;  %v2547_v13 = vld [vmem:[%s3459_s2 + $0x58] sm:$0xff] }
  0x2e   : > { %1706 = vmatpush.bf16.msrb.mxu3 %v2567_v60  ;;  %1755 = vmatpush.bf16.msrb.mxu0 %v2575_v61  ;;  %v541_v37 = vmax.f32 %v381_v1, %v509_v23  ;;  %v452_v38 = vrot.slane %v356_v24, 4  ;;  %v453_v39 = vrot.slane %v357_v25, 4  ;;  %v514_v40 = vunpack.c.l.bf16 %v450_v30  ;;  %v2563_v20 = vld [vmem:[%s3459_s2 + $0xd8] sm:$0xff] }
  0x2f   : > { %1597 = vmatmul.bf16.vlgmr.msra.gmra.mxu3 %v2941_v26  ;;  %2708 = vst [vmem:[#allocation2 + $0x18] sm:$0xff] %v2626_v33   ;;  %v624_v43 = vmax.f32 %v538_v27, %v540_v35  ;;  %v515_v44 = vunpack.c.l.bf16 %v451_v36  ;;  %v362_v46 = vunpack.c.l.bf16 %v330_v41  ;;  %v363_v60 = vunpack.c.l.bf16 %v331_v45  ;;  %v2571_v23 = vld [vmem:[%s3459_s2 + $0x118] sm:$0xff]  ;;  %v2546_v27 = vld [vmem:[%s3459_s2 + $0x50] sm:$0xff]  ;;  %v2545_v33 = vld [vmem:[%s3459_s2 + $0x48] sm:$0xff] }
  0x30   : > { %v625_v48 = vmax.f32 %v539_v34, %v541_v37  ;;  %v516_v49 = vunpack.c.l.bf16 %v452_v38  ;;  %v517_v50 = vunpack.c.l.bf16 %v453_v39  ;;  %v546_v51 = vmax.f32 %v386_v17, %v514_v40  ;;  %v2553_v34 = vld [vmem:[%s3459_s2 + $0x88] sm:$0xff]  ;;  %v2544_v39 = vld [vmem:[%s3459_s2 + $0x40] sm:$0xff] }
  0x31   : > { %1658 = vmatpush.bf16.msrb.mxu2 %v2558_v3  ;;  %1609 = vmatpush.bf16.msrb.mxu1 %v2550_v7  ;;  %v2960_v55 = vld [vmem:[#allocation2] sm:$0xff]  ;;  %v547_v58 = vmax.f32 %v387_v18, %v515_v44  ;;  %v364_v61 = vunpack.c.l.bf16 %v332_v53  ;;  %v426_v62 = vrot.slane %v330_v41, 4  ;;  %v427_v2 = vrot.slane %v331_v45, 4  ;;  %v2561_v37 = vld [vmem:[%s3459_s2 + $0xc8] sm:$0xff]  ;;  %v2591_v44 = vld [vmem:[%s3459_s2 + $0x1b8] sm:$0xff] }
  0x32   : > { %1707 = vmatpush.bf16.msrb.mxu3 %v2566_v14  ;;  %1756 = vmatpush.bf16.msrb.mxu0 %v2574_v19  ;;  %v2636_v63 = vpack.c.bf16 %v625_v48, %v624_v43  ;;  %v548_v0 = vmax.f32 %v388_v28, %v516_v49  ;;  %v549_v1 = vmax.f32 %v389_v29, %v517_v50  ;;  %v2564_v3 = vld [vmem:[%s3459_s2 + $0xe0] sm:$0xff]  ;;  %v365_v4 = vunpack.c.l.bf16 %v333_v54  ;;  %v2554_v28 = vld [vmem:[%s3459_s2 + $0x90] sm:$0xff]  ;;  %v2569_v38 = vld [vmem:[%s3459_s2 + $0x108] sm:$0xff] }
  0x33   : > { %1567 = vmatmul.bf16.vlgmr.msra.gmra.mxu0 %v2960_v55  ;;  %v428_v5 = vrot.slane %v332_v53, 4  ;;  %v429_v6 = vrot.slane %v333_v54, 4  ;;  %v490_v7 = vunpack.c.l.bf16 %v426_v62  ;;  %v491_v11 = vunpack.c.l.bf16 %v427_v2  ;;  %v2552_v40 = vld [vmem:[%s3459_s2 + $0x80] sm:$0xff]  ;;  %v2583_v48 = vld [vmem:[%s3459_s2 + $0x178] sm:$0xff]  ;;  %v2606_v62 = vld [vmem:[%s3459_s2 + $0x230] sm:$0xff] }
  0x34   : > { %2710 = vst [vmem:[#allocation2 + $0x28] sm:$0xff] %v2636_v63   ;;  %v628_v9 = vmax.f32 %v546_v51, %v548_v0  ;;  %v629_v10 = vmax.f32 %v547_v58, %v549_v1  ;;  %v824_v35 = vshll.u32 %v2960_v55, 16  ;;  %v822_v41 = vshrl.u32 %v2960_v55, 16  ;;  %v2560_v43 = vld [vmem:[%s3459_s2 + $0xc0] sm:$0xff]  ;;  %v2607_v49 = vld [vmem:[%s3459_s2 + $0x238] sm:$0xff]  ;;  %v2598_v58 = vld [vmem:[%s3459_s2 + $0x1f0] sm:$0xff] }
  0x35   : > { %1659 = vmatpush.bf16.msrb.mxu2 %v2557_v31  ;;  %1610 = vmatpush.bf16.msrb.mxu1 %v2549_v32  ;;  %v492_v14 = vunpack.c.l.bf16 %v428_v5  ;;  %v493_v15 = vunpack.c.l.bf16 %v429_v6  ;;  %v522_v16 = vmax.f32 %v362_v46, %v490_v7  ;;  %v523_v19 = vmax.f32 %v363_v60, %v491_v11  ;;  %v2562_v31 = vld [vmem:[%s3459_s2 + $0xd0] sm:$0xff]  ;;  %v2568_v46 = vld [vmem:[%s3459_s2 + $0x100] sm:$0xff]  ;;  %v2597_v6 = vld [vmem:[%s3459_s2 + $0x1e8] sm:$0xff] }
  0x36   : > { %1708 = vmatpush.bf16.msrb.mxu3 %v2565_v42  ;;  %1757 = vmatpush.bf16.msrb.mxu0 %v2573_v47  ;;  %v2981_v17 = vld [vmem:[#allocation2 + $0x18] sm:$0xff]  ;;  %v2646_v18 = vpack.c.bf16 %v629_v10, %v628_v9  ;;  %v2570_v32 = vld [vmem:[%s3459_s2 + $0x110] sm:$0xff]  ;;  %v826_v42 = vrot.slane %v824_v35, 1  ;;  %v898_v53 = vrot.slane %v2960_v55, 1  ;;  %v837_v0 = vshll.u32 %v2910_v52, 16  ;;  %v2581_v7 = vld [vmem:[%s3459_s2 + $0x168] sm:$0xff] }
  0x37   : > { %v524_v21 = vmax.f32 %v364_v61, %v492_v14  ;;  %v525_v22 = vmax.f32 %v365_v4, %v493_v15  ;;  %v2599_v47 = vld [vmem:[%s3459_s2 + $0x1f8] sm:$0xff]  ;;  %v2582_v55 = vld [vmem:[%s3459_s2 + $0x170] sm:$0xff]  ;;  %v901_v5 = vrot.slane %v2910_v52, 1  ;;  %v841_v10 = vshrl.u32 %v2910_v52, 16  ;;  %v2588_v14 = vld [vmem:[%s3459_s2 + $0x1a0] sm:$0xff] }
  0x38   : > { %2712 = vst [vmem:[#allocation2 + $0x38] sm:$0xff] %v2646_v18   ;;  %v827_v50 = vor.u32 %v826_v42, %v822_v41  ;;  %v839_v2 = vrot.slane %v837_v0, 1  ;;  %v845_v11 = vshll.u32 %v2981_v17, 16  ;;  %v2596_v18 = vld [vmem:[%s3459_s2 + $0x1e0] sm:$0xff]  ;;  %v857_v35 = vshrl.u32 %v2914_v59, 16 }
  0x39   : > { %1660 = vmatpush.bf16.msrb.mxu2 %v2556_v56  ;;  %1611 = vmatpush.bf16.msrb.mxu1 %v2548_v57  ;;  %v616_v24 = vmax.f32 %v522_v16, %v524_v21  ;;  %v617_v25 = vmax.f32 %v523_v19, %v525_v22  ;;  %v2590_v56 = vld [vmem:[%s3459_s2 + $0x1b0] sm:$0xff]  ;;  %v903_v16 = vrot.slane %v2981_v17, 1  ;;  %v2580_v19 = vld [vmem:[%s3459_s2 + $0x160] sm:$0xff]  ;;  %v849_v22 = vshrl.u32 %v2981_v17, 16 }
  0x3a   : > { %1709 = vmatpush.bf16.msrb.mxu3 %v2564_v3  ;;  %1758 = vmatpush.bf16.msrb.mxu0 %v2572_v8  ;;  %v2589_v3 = vld [vmem:[%s3459_s2 + $0x1a8] sm:$0xff]  ;;  %v869_v0 = vshll.u32 %v2941_v26, 16 }
  0x3b   : > { %v2996_v29 = vld [vmem:[#allocation2 + $0x28] sm:$0xff]  ;;  %v2616_v30 = vpack.c.bf16 %v617_v25, %v616_v24  ;;  %v3101_v21 = vsel %vm897_vm1, %v901_v5, %v903_v16 }
  0x3c   : > { %1582 = vmatmul.bf16.gmra.mxu1 %v2981_v17  ;;  %1592 = vmatmul.bf16.gmra.mxu2 %v2996_v29  ;;  %v2605_v8 = vld [vmem:[%s3459_s2 + $0x228] sm:$0xff]  ;;  %v907_v42 = vrot.slane %v2996_v29, 1 }
  0x3d   : > { %1661 = vmatpush.bf16.msrb.mxu2 %v2555_v12  ;;  %1612 = vmatpush.bf16.msrb.mxu1 %v2547_v13  ;;  %2706 = vst [vmem:[#allocation2 + $0x8] sm:$0xff] %v2616_v30   ;;  %v843_v12 = vor.u32 %v841_v10, %v839_v2  ;;  %v847_v13 = vrot.slane %v845_v11, 1  ;;  %v905_v30 = vrot.slane %v2914_v59, 1 }
  0x3e   : > { %1710 = vmatpush.bf16.msrb.mxu3 %v2563_v20  ;;  %1759 = vmatpush.bf16.msrb.mxu0 %v2571_v23  ;;  %v2604_v20 = vld [vmem:[%s3459_s2 + $0x220] sm:$0xff]  ;;  %v853_v23 = vshll.u32 %v2914_v59, 16 }
  0x3f   : > { %v3012_v36 = vld [vmem:[#allocation2 + $0x38] sm:$0xff]  ;;  %v3087_v15 = vsel %vm820_vm0, %v843_v12, %v847_v13  ;;  %v851_v24 = vor.u32 %v849_v22, %v847_v13  ;;  %v2585_v12 = vld [vmem:[%s3459_s2 + $0x188] sm:$0xff] }
  0x40   : > { %1602 = vmatmul.bf16.gmra.mxu3 %v3012_v36  ;;  %v855_v25 = vrot.slane %v853_v23, 1 }
  0x41   : > { %1613 = vmatpush.bf16.msrb.mxu1 %v2546_v27  ;;  %1662 = vmatpush.bf16.msrb.mxu2 %v2554_v28  ;;  %v2587_v27 = vld [vmem:[%s3459_s2 + $0x198] sm:$0xff] }
  0x42   : > { %1711 = vmatpush.bf16.msrb.mxu3 %v2562_v31  ;;  %1760 = vmatpush.bf16.msrb.mxu0 %v2570_v32  ;;  %v3112_v28 = vsel %vm820_vm0, %v851_v24, %v855_v25  ;;  %v2595_v31 = vld [vmem:[%s3459_s2 + $0x1d8] sm:$0xff] }
  0x43   : > { %v2579_v32 = vld [vmem:[%s3459_s2 + $0x158] sm:$0xff] }
  0x44   : > { %v2529_v45 = vld [vmem:[#allocation2 + $0x8] sm:$0xff] }
  0x45   : > { %1614 = vmatpush.bf16.msrb.mxu1 %v2545_v33  ;;  %1663 = vmatpush.bf16.msrb.mxu2 %v2553_v34  ;;  %v829_v51 = vshll.u32 %v2529_v45, 16  ;;  %v899_v54 = vrot.slane %v2529_v45, 1  ;;  %v833_v63 = vshrl.u32 %v2529_v45, 16  ;;  %v2603_v33 = vld [vmem:[%s3459_s2 + $0x218] sm:$0xff]  ;;  %v3126_v34 = vsel %vm897_vm1, %v903_v16, %v905_v30  ;;  %v667_v16 = vld [vmem:[%s3145_s22 + $0x28] sm:$0xff] }
  0x46   : > { %1712 = vmatpush.bf16.msrb.mxu3 %v2561_v37  ;;  %1761 = vmatpush.bf16.msrb.mxu0 %v2569_v38  ;;  %v861_v37 = vshll.u32 %v2996_v29, 16  ;;  %v859_v38 = vor.u32 %v857_v35, %v855_v25  ;;  %v691_v23 = vrot.slane %v667_v16, 4  ;;  %v2593_v35 = vld [vmem:[%s3459_s2 + $0x1c8] sm:$0xff] }
  0x47   : > { %1572 = vmatmul.bf16.gmra.mxu0 %v2529_v45  ;;  %v831_v57 = vrot.slane %v829_v51, 1  ;;  %v900_v61 = vsel %vm897_vm1, %v898_v53, %v899_v54  ;;  %v3077_v9 = vsel %vm897_vm1, %v899_v54, %v901_v5 }
  0x49   : > { %1615 = vmatpush.bf16.msrb.mxu1 %v2544_v39  ;;  %1664 = vmatpush.bf16.msrb.mxu2 %v2552_v40  ;;  %v832_v60 = vsel %vm820_vm0, %v827_v50, %v831_v57  ;;  %v835_v1 = vor.u32 %v833_v63, %v831_v57  ;;  %v863_v39 = vrot.slane %v861_v37, 1  ;;  %v2586_v40 = vld [vmem:[%s3459_s2 + $0x190] sm:$0xff]  ;;  %v665_v50 = vld [vmem:[%s3145_s22 + $0x18] sm:$0xff]  ;;  %v865_v63 = vshrl.u32 %v2996_v29, 16  ;;  %v2577_v37 = vld [vmem:[%s3459_s2 + $0x148] sm:$0xff] }
  0x4a   : > { %1713 = vmatpush.bf16.msrb.mxu3 %v2560_v43  ;;  %1762 = vmatpush.bf16.msrb.mxu0 %v2568_v46  ;;  %v2594_v43 = vld [vmem:[%s3459_s2 + $0x1d0] sm:$0xff]  ;;  %v662_v46 = vld [vmem:[%s3145_s22] sm:$0xff] }
  0x4b   : > { %v840_v4 = vsel %vm820_vm0, %v835_v1, %v839_v2  ;;  %v3139_v41 = vsel %vm820_vm0, %v859_v38, %v863_v39  ;;  %v686_v51 = vrot.slane %v662_v46, 4  ;;  %v670_v54 = vunpack.c.l.bf16 %v662_v46  ;;  %v2601_v46 = vld [vmem:[%s3459_s2 + $0x208] sm:$0xff] }
  0x4c   : > { %1616 = vmatmul.bf16.vlgmr.msrb.gmra.mxu1 %v832_v60  ;;  %1665 = vmatmul.bf16.vlgmr.msrb.gmra.mxu2 %v900_v61  ;;  %v689_v60 = vrot.slane %v665_v50, 4 }
  0x4d   : > { %1853 = vmatpush.bf16.msra.mxu2 %v2591_v44  ;;  %1804 = vmatpush.bf16.msra.mxu1 %v2583_v48  ;;  %v2578_v44 = vld [vmem:[%s3459_s2 + $0x150] sm:$0xff]  ;;  %v3162_v48 = vsel %vm897_vm1, %v905_v30, %v907_v42  ;;  %v702_v61 = vunpack.c.l.bf16 %v686_v51  ;;  %v675_v30 = vunpack.c.l.bf16 %v667_v16  ;;  %v873_v51 = vshrl.u32 %v2941_v26, 16 }
  0x4e   : > { %1902 = vmatpush.bf16.msra.mxu3 %v2599_v47  ;;  %1951 = vmatpush.bf16.msra.mxu0 %v2607_v49  ;;  %v663_v47 = vld [vmem:[%s3145_s22 + $0x8] sm:$0xff]  ;;  %v664_v49 = vld [vmem:[%s3145_s22 + $0x10] sm:$0xff]  ;;  %v705_v2 = vunpack.c.l.bf16 %v689_v60  ;;  %v2584_v60 = vld [vmem:[%s3459_s2 + $0x180] sm:$0xff] }
  0x4f   : > { %v687_v53 = vrot.slane %v663_v47, 4  ;;  %v672_v57 = vunpack.c.l.bf16 %v664_v49 }
  0x50   : > { %1714 = vmatmul.bf16.vlgmr.msrb.gmra.mxu3 %v2529_v45  ;;  %v2602_v45 = vld [vmem:[%s3459_s2 + $0x210] sm:$0xff] }
  0x51   : > { %1854 = vmatpush.bf16.msra.mxu2 %v2590_v56  ;;  %1805 = vmatpush.bf16.msra.mxu1 %v2582_v55  ;;  %v671_v56 = vunpack.c.l.bf16 %v663_v47  ;;  %v688_v55 = vrot.slane %v664_v49, 4 }
  0x52   : > { %1903 = vmatpush.bf16.msra.mxu3 %v2598_v58  ;;  %1952 = vmatpush.bf16.msra.mxu0 %v2606_v62  ;;  %v673_v58 = vunpack.c.l.bf16 %v665_v50  ;;  %v703_v62 = vunpack.c.l.bf16 %v687_v53  ;;  %v877_v53 = vshll.u32 %v3012_v36, 16 }
  0x53   : > { %v704_v1 = vunpack.c.l.bf16 %v688_v55 }
  0x54   : > { %v879_v55 = vrot.slane %v877_v53, 1 }
  0x55   : > { %1855 = vmatpush.bf16.msra.mxu2 %v2589_v3  ;;  %1806 = vmatpush.bf16.msra.mxu1 %v2581_v7  ;;  %v710_v3 = vmax.f32 %v670_v54, %v702_v61  ;;  %v712_v5 = vmax.f32 %v672_v57, %v704_v1  ;;  %v867_v7 = vor.u32 %v865_v63, %v863_v39  ;;  %v707_v39 = vunpack.c.l.bf16 %v691_v23  ;;  %v2576_v63 = vld [vmem:[%s3459_s2 + $0x140] sm:$0xff] }
  0x56   : > { %1904 = vmatpush.bf16.msra.mxu3 %v2597_v6  ;;  %1953 = vmatpush.bf16.msra.mxu0 %v2605_v8  ;;  %v713_v6 = vmax.f32 %v673_v58, %v705_v2  ;;  %v871_v8 = vrot.slane %v869_v0, 1  ;;  %v3214_v61 = vrot.slane %v3012_v36, 1 }
  0x57   : > { %1763 = vmatmul.bf16.vlgmr.msrb.gmra.mxu0 %v840_v4  ;;  %v734_v10 = vmax.f32 %v710_v3, %v712_v5  ;;  %v881_v3 = vshrl.u32 %v3012_v36, 16  ;;  %v3235_v5 = vld [vmem:[%s3460_s3] ss:$0 sm:$0xff] }
  0x58   : > { %v875_v58 = vor.u32 %v873_v51, %v871_v8 }
  0x59   : > { %1856 = vmatpush.bf16.msra.mxu2 %v2588_v14  ;;  %1807 = vmatpush.bf16.msra.mxu1 %v2580_v19  ;;  %v666_v14 = vld [vmem:[%s3145_s22 + $0x20] sm:$0xff]  ;;  %v3180_v19 = vsel %vm820_vm0, %v867_v7, %v871_v8 }
  0x5a   : > { %1905 = vmatpush.bf16.msra.mxu3 %v2596_v18  ;;  %1954 = vmatpush.bf16.msra.mxu0 %v2604_v20  ;;  %v668_v18 = vld [vmem:[%s3145_s22 + $0x30] sm:$0xff]  ;;  %v669_v20 = vld [vmem:[%s3145_s22 + $0x38] sm:$0xff]  ;;  %v690_v22 = vrot.slane %v666_v14, 4  ;;  %v2600_v7 = vld [vmem:[%s3459_s2 + $0x200] sm:$0xff] }
  0x5b   : > { %v692_v24 = vrot.slane %v668_v18, 4  ;;  %v693_v25 = vrot.slane %v669_v20, 4 }
  0x5c   : > { %1621 = vmatmul.bf16.gmra.mxu1 %v840_v4  ;;  %1670 = vmatmul.bf16.gmra.mxu2 %v3077_v9  ;;  %v711_v4 = vmax.f32 %v671_v56, %v703_v62  ;;  %v706_v38 = vunpack.c.l.bf16 %v690_v22  ;;  %v2592_v62 = vld [vmem:[%s3459_s2 + $0x1c0] sm:$0xff] }
  0x5d   : > { %1857 = vmatpush.bf16.msra.mxu2 %v2587_v27  ;;  %1808 = vmatpush.bf16.msra.mxu1 %v2579_v32  ;;  %v674_v27 = vunpack.c.l.bf16 %v666_v14  ;;  %v677_v32 = vunpack.c.l.bf16 %v669_v20 }
  0x5e   : > { %1906 = vmatpush.bf16.msra.mxu3 %v2595_v31  ;;  %1955 = vmatpush.bf16.msra.mxu0 %v2603_v33  ;;  %v735_v11 = vmax.f32 %v711_v4, %v713_v6  ;;  %v676_v31 = vunpack.c.l.bf16 %v668_v18  ;;  %v909_v33 = vrot.slane %v2941_v26, 1 }
  0x60   : > { %1719 = vmatmul.bf16.gmra.mxu3 %v2910_v52  ;;  %v3174_v13 = vpack.c.bf16 %v735_v11, %v734_v10  ;;  %v3197_v50 = vsel %vm897_vm1, %v907_v42, %v909_v33  ;;  %v3207_v42 = vsel %vm820_vm0, %v875_v58, %v879_v55  ;;  %v3227_v2 = vsel %vm897_vm1, %v909_v33, %v3214_v61 }
  0x61   : > { %1858 = vmatpush.bf16.msra.mxu2 %v2586_v40  ;;  %1809 = vmatpush.bf16.msra.mxu1 %v2578_v44  ;;  %v708_v40 = vunpack.c.l.bf16 %v692_v24  ;;  %v714_v44 = vmax.f32 %v674_v27, %v706_v38  ;;  %v883_v11 = vor.u32 %v881_v3, %v879_v55 }
  0x62   : > { %1907 = vmatpush.bf16.msra.mxu3 %v2594_v43  ;;  %1956 = vmatpush.bf16.msra.mxu0 %v2602_v45  ;;  %v709_v43 = vunpack.c.l.bf16 %v693_v25  ;;  %v715_v45 = vmax.f32 %v675_v30, %v707_v39  ;;  %v2660_v1 = vunpack.c.l.b16 %v3174_v13  ;;  %v931_v4 = vshll.u32 %v3174_v13, 16 }
  0x63   : > { %v716_v47 = vmax.f32 %v676_v31, %v708_v40 }
  0x64   : > { %v717_v49 = vmax.f32 %v677_v32, %v709_v43  ;;  %v819_v6 = vpack.c.b16 %v2660_v1, %v2660_v1  ;;  %v935_v43 = vshrl.u32 %v3174_v13, 16 }
  0x65   : > { %1859 = vmatpush.bf16.msra.mxu2 %v2585_v12  ;;  %1810 = vmatpush.bf16.msra.mxu1 %v2577_v37  ;;  %v736_v54 = vmax.f32 %v714_v44, %v716_v47  ;;  %v933_v12 = vrot.slane %v931_v4, 1 }
  0x66   : > { %1908 = vmatpush.bf16.msra.mxu3 %v2593_v35  ;;  %1957 = vmatpush.bf16.msra.mxu0 %v2601_v46  ;;  %v737_v56 = vmax.f32 %v715_v45, %v717_v49  ;;  %v885_v18 = vshll.u32 %v819_v6, 16  ;;  %v913_v31 = vrot.slane %v819_v6, 1 }
  0x67   : > { %1768 = vmatmul.bf16.gmra.mxu0 %v3087_v15  ;;  %v3251_v23 = vsel %vm820_vm0, %v883_v11, %v933_v12  ;;  %v3270_v45 = vor.u32 %v935_v43, %v933_v12 }
  0x68   : > { %v3203_v57 = vpack.c.bf16 %v737_v56, %v736_v54  ;;  %v887_v25 = vrot.slane %v885_v18, 1  ;;  %v914_v40 = vsel %vm897_vm1, %v3214_v61, %v913_v31 }
  0x69   : > { %1860 = vmatpush.bf16.msra.mxu2 %v2584_v60  ;;  %1811 = vmatpush.bf16.msra.mxu1 %v2576_v63 }
  0x6a   : > { %1909 = vmatpush.bf16.msra.mxu3 %v2592_v62  ;;  %1958 = vmatpush.bf16.msra.mxu0 %v2600_v7  ;;  %v2664_v24 = vunpack.c.l.b16 %v3203_v57  ;;  %v888_v35 = vsel %vm820_vm0, %v883_v11, %v887_v25 }
  0x6c   : > { %1626 = vmatmul.bf16.gmra.mxu1 %v3087_v15  ;;  %1675 = vmatmul.bf16.gmra.mxu2 %v3101_v21  ;;  %v3260_v33 = vpack.c.b16 %v2664_v24, %v2664_v24 }
  0x6e   : > { %v939_v44 = vshll.u32 %v3260_v33, 16 }
  0x70   : > { %1724 = vmatmul.bf16.gmra.mxu3 %v2981_v17  ;;  %v941_v46 = vrot.slane %v939_v44, 1 }
  0x72   : > { %v942_v54 = vsel %vm820_vm0, %v3270_v45, %v941_v46 }
  0x77   : > { %1773 = vmatmul.bf16.gmra.mxu0 %v3112_v28 }
  0x7c   : > { %1631 = vmatmul.bf16.gmra.mxu1 %v3112_v28  ;;  %1680 = vmatmul.bf16.gmra.mxu2 %v3126_v34 }
  0x80   : > { %1729 = vmatmul.bf16.gmra.mxu3 %v2914_v59 }
  0x87   : > { %1778 = vmatmul.bf16.gmra.mxu0 %v3139_v41 }
  0x8c   : > { %1636 = vmatmul.bf16.gmra.mxu1 %v3139_v41  ;;  %1685 = vmatmul.bf16.gmra.mxu2 %v3162_v48 }
  0x90   : > { %1734 = vmatmul.bf16.gmra.mxu3 %v2996_v29 }
  0x97   : > { %1783 = vmatmul.bf16.gmra.mxu0 %v3180_v19 }
  0x9c   : > { %1641 = vmatmul.bf16.gmra.mxu1 %v3180_v19  ;;  %1690 = vmatmul.bf16.gmra.mxu2 %v3197_v50 }
  0xa0   : > { %1739 = vmatmul.bf16.gmra.mxu3 %v2941_v26 }
  0xa7   : > { %1788 = vmatmul.bf16.gmra.mxu0 %v3207_v42 }
  0xa9   : > { %v3222_v0 = vpop.f32.mrf.mxu1 }
  0xac   : > { %1646 = vmatmul.bf16.gmra.mxu1 %v3207_v42  ;;  %1695 = vmatmul.bf16.gmra.mxu2 %v3227_v2 }
  0xaf   : > { %v1588_v8 = vpop.f32.mrf.mxu2 }
  0xb0   : > { %v3242_v10 = vadd.f32 %v3235_v5, %v1588_v8  ;;  %v1568_v16 = vpop.f32.mrf.mxu0  ;;  %1744 = vmatmul.bf16.gmra.mxu3 %v3012_v36 }
  0xb1   : > { %v3244_v14 = vpop.f32.mrf.mxu1  ;;  %v1569_v55 = vadd.f32 %v3235_v5, %v1568_v16 }
  0xb2   : > { %v1598_v20 = vpop.f32.mrf.mxu3 }
  0xb3   : > { %v3248_v22 = vadd.f32 %v3235_v5, %v1598_v20 }
  0xb7   : > { %v1590_v27 = vpop.f32.mrf.mxu2  ;;  %1793 = vmatmul.bf16.gmra.mxu0 %v3251_v23 }
  0xb8   : > { %v3256_v30 = vadd.f32 %v3235_v5, %v1590_v27  ;;  %v1570_v37 = vpop.f32.mrf.mxu0 }
  0xb9   : > { %v3258_v32 = vpop.f32.mrf.mxu1  ;;  %v1571_v7 = vadd.f32 %v3235_v5, %v1570_v37 }
  0xba   : > { %v1600_v38 = vpop.f32.mrf.mxu3 }
  0xbb   : > { %v3264_v39 = vadd.f32 %v3235_v5, %v1600_v38 }
  0xbc   : > { %1651 = vmatmul.bf16.gmra.mxu1 %v888_v35  ;;  %1700 = vmatmul.bf16.gmra.mxu2 %v914_v40 }
  0xbf   : > { %v1593_v49 = vpop.f32.mrf.mxu2 }
  0xc0   : > { %1749 = vmatmul.bf16.gmra.mxu3 %v3174_v13  ;;  %v3276_v51 = vadd.f32 %v3235_v5, %v1593_v49 }
  0xc1   : > { %v3272_v47 = vpop.f32.mrf.mxu1 }
  0xc3   : > { %v1603_v56 = vpop.f32.mrf.mxu3 }
  0xc4   : > { %v1573_v53 = vpop.f32.mrf.mxu0  ;;  %v3281_v58 = vadd.f32 %v3235_v5, %v1603_v56 }
  0xc7   : > { %1798 = vmatmul.bf16.gmra.mxu0 %v942_v54  ;;  %v1595_v60 = vpop.f32.mrf.mxu2 }
  0xc8   : > { %v3285_v63 = vadd.f32 %v3235_v5, %v1595_v60 }
  0xc9   : > { %v1617_v62 = vpop.f32.mrf.mxu1 }
  0xca   : > { %v1618_v1 = vadd.f32 %v1617_v62, %v1569_v55 }
  0xcb   : > { %v1605_v4 = vpop.f32.mrf.mxu3 }
  0xcc   : > { %v1575_v3 = vpop.f32.mrf.mxu0  ;;  %1812 = vmatmul.bf16.vlgmr.msra.gmra.mxu1 %v3077_v9  ;;  %v3289_v6 = vadd.f32 %v3235_v5, %v1605_v4  ;;  %1861 = vmatmul.bf16.vlgmr.msra.gmra.mxu2 %v2910_v52  ;;  %v1574_v9 = vadd.f32 %v3235_v5, %v1573_v53 }
  0xcd   : > { %v1576_v40 = vadd.f32 %v3235_v5, %v1575_v3 }
  0xcf   : > { %v1666_v8 = vpop.f32.mrf.mxu2 }
  0xd0   : > { %1910 = vmatmul.bf16.vlgmr.msra.gmra.mxu3 %v3087_v15  ;;  %v1667_v12 = vadd.f32 %v1666_v8, %v1618_v1  ;;  %v1581_v8 = vadd.f32 %v3235_v5, %v3244_v14 }
  0xd1   : > { %v1619_v11 = vpop.f32.mrf.mxu1 }
  0xd2   : > { %v1620_v16 = vadd.f32 %v1619_v11, %v1571_v7 }
  0xd3   : > { %v1715_v20 = vpop.f32.mrf.mxu3 }
  0xd4   : > { %v1764_v18 = vpop.f32.mrf.mxu0  ;;  %v1716_v24 = vadd.f32 %v1715_v20, %v1667_v12 }
  0xd6   : > { %v3296_v25 = vadd.f32 %v1764_v18, %v1716_v24 }
  0xd7   : > { %1959 = vmatmul.bf16.vlgmr.msra.gmra.mxu0 %v3101_v21  ;;  %v1668_v27 = vpop.f32.mrf.mxu2 }
  0xd8   : > { %v1669_v52 = vadd.f32 %v1668_v27, %v1620_v16 }
  0xd9   : > { %v1622_v31 = vpop.f32.mrf.mxu1 }
  0xda   : > { %v1623_v35 = vadd.f32 %v1622_v31, %v1574_v9 }
  0xdb   : > { %v1717_v38 = vpop.f32.mrf.mxu3 }
  0xdc   : > { %v1766_v37 = vpop.f32.mrf.mxu0  ;;  %1817 = vmatmul.bf16.gmra.mxu1 %v3101_v21  ;;  %v1718_v15 = vadd.f32 %v1717_v38, %v1669_v52  ;;  %1866 = vmatmul.bf16.gmra.mxu2 %v2981_v17  ;;  %v1579_v21 = vadd.f32 %v3235_v5, %v3222_v0  ;;  %v1586_v38 = vadd.f32 %v3235_v5, %v3272_v47 }
  0xde   : > { %v3301_v43 = vadd.f32 %v1766_v37, %v1718_v15 }
  0xdf   : > { %v1671_v44 = vpop.f32.mrf.mxu2 }
  0xe0   : > { %1915 = vmatmul.bf16.gmra.mxu3 %v3112_v28  ;;  %v1672_v49 = vadd.f32 %v1671_v44, %v1623_v35 }
  0xe1   : > { %v1624_v46 = vpop.f32.mrf.mxu1 }
  0xe2   : > { %v1625_v53 = vadd.f32 %v1624_v46, %v1576_v40 }
  0xe3   : > { %v1720_v56 = vpop.f32.mrf.mxu3 }
  0xe4   : > { %v1769_v54 = vpop.f32.mrf.mxu0  ;;  %v1721_v55 = vadd.f32 %v1720_v56, %v1672_v49 }
  0xe6   : > { %v3307_v60 = vadd.f32 %v1769_v54, %v1721_v55 }
  0xe7   : > { %1964 = vmatmul.bf16.gmra.mxu0 %v3126_v34  ;;  %v1673_v17 = vpop.f32.mrf.mxu2 }
  0xe8   : > { %v1674_v1 = vadd.f32 %v1673_v17, %v1625_v53 }
  0xe9   : > { %v1627_v62 = vpop.f32.mrf.mxu1 }
  0xea   : > { %v1628_v3 = vadd.f32 %v1627_v62, %v1579_v21 }
  0xeb   : > { %v1722_v28 = vpop.f32.mrf.mxu3 }
  0xec   : > { %v1771_v4 = vpop.f32.mrf.mxu0  ;;  %1822 = vmatmul.bf16.gmra.mxu1 %v3126_v34  ;;  %v1723_v7 = vadd.f32 %v1722_v28, %v1674_v1  ;;  %1871 = vmatmul.bf16.gmra.mxu2 %v2914_v59  ;;  %v1584_v34 = vadd.f32 %v3235_v5, %v3258_v32 }
  0xee   : > { %v3313_v11 = vadd.f32 %v1771_v4, %v1723_v7  ;;  %v2801_v7 = vmov 0  }
  0xef   : > { %v1676_v12 = vpop.f32.mrf.mxu2  ;;  %746 = vst [vmem:[#allocation2 + $0x50] sm:$0xf] %v2801_v7 }
  0xf0   : > { %1920 = vmatmul.bf16.gmra.mxu3 %v3139_v41  ;;  %v1677_v16 = vadd.f32 %v1676_v12, %v1628_v3 }
  0xf1   : > { %v1629_v0 = vpop.f32.mrf.mxu1 }
  0xf2   : > { %v1630_v18 = vadd.f32 %v1629_v0, %v1581_v8 }
  0xf3   : > { %v1725_v24 = vpop.f32.mrf.mxu3 }
  0xf4   : > { %v1774_v20 = vpop.f32.mrf.mxu0  ;;  %v1726_v9 = vadd.f32 %v1725_v24, %v1677_v16 }
  0xf6   : > { %v3319_v59 = vadd.f32 %v1774_v20, %v1726_v9 }
  0xf7   : > { %1969 = vmatmul.bf16.gmra.mxu0 %v3162_v48  ;;  %v1678_v27 = vpop.f32.mrf.mxu2 }
  0xf8   : > { %v1679_v31 = vadd.f32 %v1678_v27, %v1630_v18 }
  0xf9   : > { %v1632_v14 = vpop.f32.mrf.mxu1 }
  0xfa   : > { %v1633_v52 = vadd.f32 %v1632_v14, %v1584_v34 }
  0xfb   : > { %v1727_v41 = vpop.f32.mrf.mxu3 }
  0xfc   : > { %v1776_v35 = vpop.f32.mrf.mxu0  ;;  %1827 = vmatmul.bf16.gmra.mxu1 %v3162_v48  ;;  %v1728_v37 = vadd.f32 %v1727_v41, %v1679_v31  ;;  %1876 = vmatmul.bf16.gmra.mxu2 %v2996_v29 }
  0xfe   : > { %v3325_v15 = vadd.f32 %v1776_v35, %v1728_v37 }
  0xff   : > { %v1681_v40 = vpop.f32.mrf.mxu2 }
 0x100   : > { %1925 = vmatmul.bf16.gmra.mxu3 %v3180_v19  ;;  %v1682_v44 = vadd.f32 %v1681_v40, %v1633_v52 }
 0x101   : > { %v1634_v32 = vpop.f32.mrf.mxu1 }
 0x102   : > { %v1635_v46 = vadd.f32 %v1634_v32, %v1586_v38 }
 0x103   : > { %v1730_v53 = vpop.f32.mrf.mxu3 }
 0x104   : > { %v1779_v49 = vpop.f32.mrf.mxu0  ;;  %v1731_v54 = vadd.f32 %v1730_v53, %v1682_v44  ;;  %v973_v53 = vrot.slane %v3203_v57, 1 }
 0x106   : > { %v3329_v48 = vadd.f32 %v1779_v49, %v1731_v54 }
 0x107   : > { %1974 = vmatmul.bf16.gmra.mxu0 %v3197_v50  ;;  %v1683_v56 = vpop.f32.mrf.mxu2 }
 0x108   : > { %v1684_v55 = vadd.f32 %v1683_v56, %v1635_v46 }
 0x109   : > { %v1637_v29 = vpop.f32.mrf.mxu1 }
 0x10a   : > { %v1638_v5 = vadd.f32 %v1637_v29, %v3242_v10 }
 0x10b   : > { %v1732_v21 = vpop.f32.mrf.mxu3 }
 0x10c   : > { %v1781_v47 = vpop.f32.mrf.mxu0  ;;  %1832 = vmatmul.bf16.gmra.mxu1 %v3197_v50  ;;  %v1733_v17 = vadd.f32 %v1732_v21, %v1684_v55  ;;  %1881 = vmatmul.bf16.gmra.mxu2 %v2941_v26 }
 0x10e   : > { %v3334_v19 = vadd.f32 %v1781_v47, %v1733_v17 }
 0x10f   : > { %v1686_v62 = vpop.f32.mrf.mxu2 }
 0x110   : > { %1930 = vmatmul.bf16.gmra.mxu3 %v3207_v42  ;;  %v1687_v3 = vadd.f32 %v1686_v62, %v1638_v5 }
 0x111   : > { %v1639_v1 = vpop.f32.mrf.mxu1 }
 0x112   : > { %v1640_v4 = vadd.f32 %v1639_v1, %v3256_v30  ;;  %v945_v30 = vrot.slane %v3174_v13, 1 }
 0x113   : > { %v1735_v10 = vpop.f32.mrf.mxu3 }
 0x114   : > { %v1784_v28 = vpop.f32.mrf.mxu0  ;;  %v1736_v8 = vadd.f32 %v1735_v10, %v1687_v3  ;;  %v974_v21 = vsel %vm897_vm1, %v945_v30, %v973_v53 }
 0x116   : > { %v3339_v50 = vadd.f32 %v1784_v28, %v1736_v8 }
 0x117   : > { %1979 = vmatmul.bf16.gmra.mxu0 %v3227_v2  ;;  %v1688_v12 = vpop.f32.mrf.mxu2 }
 0x118   : > { %v1689_v0 = vadd.f32 %v1688_v12, %v1640_v4 }
 0x119   : > { %v1642_v26 = vpop.f32.mrf.mxu1 }
 0x11a   : > { %v1643_v16 = vadd.f32 %v1642_v26, %v3276_v51  ;;  %v946_v51 = vsel %vm897_vm1, %v3214_v61, %v945_v30 }
 0x11b   : > { %v1737_v42 = vpop.f32.mrf.mxu3 }
 0x11c   : > { %v1786_v18 = vpop.f32.mrf.mxu0  ;;  %1837 = vmatmul.bf16.gmra.mxu1 %v3227_v2  ;;  %v1738_v20 = vadd.f32 %v1737_v42, %v1689_v0  ;;  %1886 = vmatmul.bf16.gmra.mxu2 %v3012_v36  ;;  %v959_v36 = vshll.u32 %v3203_v57, 16 }
 0x11e   : > { %v3345_v24 = vadd.f32 %v1786_v18, %v1738_v20 }
 0x11f   : > { %v1691_v9 = vpop.f32.mrf.mxu2 }
 0x120   : > { %1935 = vmatmul.bf16.gmra.mxu3 %v3251_v23  ;;  %v1692_v27 = vadd.f32 %v1691_v9, %v1643_v16  ;;  %v961_v23 = vrot.slane %v959_v36, 1 }
 0x121   : > { %v1644_v34 = vpop.f32.mrf.mxu1 }
 0x122   : > { %v1645_v14 = vadd.f32 %v1644_v34, %v3285_v63  ;;  %v768_v63 = vld [vmem:[#allocation2 + $0x50] sm:$0xf]  ;;  %v962_v61 = vsel %vm820_vm0, %v3270_v45, %v961_v23  ;;  %v963_v45 = vshrl.u32 %v3203_v57, 16 }
 0x123   : > { %v1740_v2 = vpop.f32.mrf.mxu3  ;;  %v956_v49 = vunpack.c.l.b16 %v768_v63 }
 0x124   : > { %v1789_v31 = vpop.f32.mrf.mxu0  ;;  %v1741_v52 = vadd.f32 %v1740_v2, %v1692_v27  ;;  %v965_v8 = vor.u32 %v963_v45, %v961_v23 }
 0x125   : > { %v957_v5 = vpack.c.b16 %v956_v49, %v956_v49 }
 0x126   : > { %v3352_v35 = vadd.f32 %v1789_v31, %v1741_v52 }
 0x127   : > { %1984 = vmatmul.bf16.gmra.mxu0 %v946_v51  ;;  %v1693_v41 = vpop.f32.mrf.mxu2  ;;  %v967_v1 = vshll.u32 %v957_v5, 16  ;;  %v975_v18 = vrot.slane %v957_v5, 1 }
 0x128   : > { %v1694_v38 = vadd.f32 %v1693_v41, %v1645_v14 }
 0x129   : > { %v1647_v37 = vpop.f32.mrf.mxu1  ;;  %v969_v12 = vrot.slane %v967_v1, 1  ;;  %v976_v27 = vsel %vm897_vm1, %v973_v53, %v975_v18 }
 0x12a   : > { %v1648_v40 = vadd.f32 %v1647_v37, %v3248_v22 }
 0x12b   : > { %v1742_v44 = vpop.f32.mrf.mxu3  ;;  %v970_v16 = vsel %vm820_vm0, %v965_v8, %v969_v12 }
 0x12c   : > { %v1791_v32 = vpop.f32.mrf.mxu0  ;;  %1842 = vmatmul.bf16.gmra.mxu1 %v946_v51  ;;  %v1743_v46 = vadd.f32 %v1742_v44, %v1694_v38  ;;  %1891 = vmatmul.bf16.gmra.mxu2 %v3174_v13  ;;  %v947_v13 = vrot.slane %v3260_v33, 1 }
 0x12e   : > { %v3359_v54 = vadd.f32 %v1791_v32, %v1743_v46  ;;  %v948_v7 = vsel %vm897_vm1, %v945_v30, %v947_v13  ;;  %v2016_v46 = vlaneseq }
 0x12f   : > { %v1696_v56 = vpop.f32.mrf.mxu2 }
 0x130   : > { %1940 = vmatmul.bf16.gmra.mxu3 %v962_v61  ;;  %v1697_v22 = vadd.f32 %v1696_v56, %v1648_v40 }
 0x131   : > { %v1649_v29 = vpop.f32.mrf.mxu1 }
 0x132   : > { %v1650_v55 = vadd.f32 %v1649_v29, %v3264_v39 }
 0x133   : > { %v1745_v17 = vpop.f32.mrf.mxu3 }
 0x134   : > { %v1794_v47 = vpop.f32.mrf.mxu0  ;;  %v1746_v62 = vadd.f32 %v1745_v17, %v1697_v22  ;;  %v3381_v22 = vshrl.u32 %v2016_v46, 7 }
 0x136   : > { %v3365_v3 = vadd.f32 %v1794_v47, %v1746_v62  ;;  %vm2019_vm2 = vcmp.ge.s32.totalorder %v3381_v22, 1 }
 0x137   : > { %1989 = vmatmul.bf16.gmra.mxu0 %v974_v21  ;;  %v1698_v4 = vpop.f32.mrf.mxu2  ;;  %v3384_v21 = vadd.s32 8, %v3381_v22 }
 0x138   : > { %v1699_v10 = vadd.f32 %v1698_v4, %v1650_v55 }
 0x139   : > { %v1652_v28 = vpop.f32.mrf.mxu1  ;;  %vm2022_vm3 = vcmp.le.s32.totalorder %v3384_v21, 8 }
 0x13a   : > { %v1653_v39 = vadd.f32 %v1652_v28, %v3281_v58 }
 0x13b   : > { %v1747_v0 = vpop.f32.mrf.mxu3 }
 0x13c   : > { %v1796_v26 = vpop.f32.mrf.mxu0  ;;  %1847 = vmatmul.bf16.gmra.mxu1 %v948_v7  ;;  %v1748_v33 = vadd.f32 %v1747_v0, %v1699_v10  ;;  %1896 = vmatmul.bf16.gmra.mxu2 %v3203_v57 }
 0x13e   : > { %v3371_v42 = vadd.f32 %v1796_v26, %v1748_v33 }
 0x13f   : > { %v1701_v20 = vpop.f32.mrf.mxu2 }
 0x140   : > { %1945 = vmatmul.bf16.gmra.mxu3 %v970_v16  ;;  %v1702_v30 = vadd.f32 %v1701_v20, %v1653_v39 }
 0x141   : > { %v1654_v9 = vpop.f32.mrf.mxu1 }
 0x142   : > { %v1655_v34 = vadd.f32 %v1654_v9, %v3289_v6 }
 0x143   : > { %v1750_v14 = vpop.f32.mrf.mxu3 }
 0x144   : > { %v1799_v58 = vpop.f32.mrf.mxu0  ;;  %v1751_v31 = vadd.f32 %v1750_v14, %v1702_v30 }
 0x146   : > { %v3375_v51 = vadd.f32 %v1799_v58, %v1751_v31 }
 0x147   : > { %1994 = vmatmul.bf16.gmra.mxu0 %v976_v27  ;;  %v1703_v57 = vpop.f32.mrf.mxu2 }
 0x148   : > { %v1704_v52 = vadd.f32 %v1703_v57, %v1655_v34 }
 0x149   : > { %v1813_v2 = vpop.f32.mrf.mxu1 }
 0x14a   : > { %v1814_v6 = vadd.f32 %v1813_v2, %v3296_v25 }
 0x14b   : > { %v1752_v41 = vpop.f32.mrf.mxu3 }
 0x14c   : > { %v1801_v36 = vpop.f32.mrf.mxu0  ;;  %v1753_v37 = vadd.f32 %v1752_v41, %v1704_v52 }
 0x14e   : > { %v3377_v38 = vadd.f32 %v1801_v36, %v1753_v37 }
 0x14f   : > { %v1862_v40 = vpop.f32.mrf.mxu2 }
 0x150   : > { %v1863_v63 = vadd.f32 %v1862_v40, %v1814_v6 }
 0x151   : > { %v1815_v23 = vpop.f32.mrf.mxu1 }
 0x152   : > { %v1816_v49 = vadd.f32 %v1815_v23, %v3301_v43 }
 0x153   : > { %v1911_v44 = vpop.f32.mrf.mxu3 }
 0x154   : > { %v1960_v32 = vpop.f32.mrf.mxu0  ;;  %v1912_v61 = vadd.f32 %v1911_v44, %v1863_v63 }
 0x156   : > { %v1961_v55 = vadd.f32 %v1960_v32, %v1912_v61 }
 0x157   : > { %v1864_v53 = vpop.f32.mrf.mxu2 }
 0x158   : > { %v1865_v29 = vadd.f32 %v1864_v53, %v1816_v49  ;;  %v2000_v17 = vmax.f32 %v1961_v55, 0.0 }
 0x159   : > { %v1818_v56 = vpop.f32.mrf.mxu1 }
 0x15a   : > { %v1819_v1 = vadd.f32 %v1818_v56, %v3307_v60  ;;  %v2029_v4 = vsel %vm2019_vm2, %v2000_v17, 0.0 }
 0x15b   : > { %v1913_v47 = vpop.f32.mrf.mxu3 }
 0x15c   : > { %v1962_v5 = vpop.f32.mrf.mxu0  ;;  %v1914_v25 = vadd.f32 %v1913_v47, %v1865_v29 }
 0x15e   : > { %v1963_v13 = vadd.f32 %v1962_v5, %v1914_v25 }
 0x15f   : > { %v1867_v43 = vpop.f32.mrf.mxu2 }
 0x160   : > { %v2001_v45 = vmax.f32 %v1963_v13, 0.0  ;;  %v1868_v10 = vadd.f32 %v1867_v43, %v1819_v1 }
 0x161   : > { %v1820_v62 = vpop.f32.mrf.mxu1 }
 0x162   : > { %v2030_v28 = vsel %vm2022_vm3, %v2001_v45, 0.0  ;;  %v1821_v60 = vadd.f32 %v1820_v62, %v3313_v11 }
 0x163   : > { %v2669_v39 = vpack.c.bf16 %v2030_v28, %v2029_v4  ;;  %v1916_v8 = vpop.f32.mrf.mxu3 }
 0x164   : > { %v1965_v7 = vpop.f32.mrf.mxu0  ;;  %v1917_v12 = vadd.f32 %v1916_v8, %v1868_v10 }
 0x165   : > { %2670 = vst [vmem:[%s3395_s27] sm:$0xff] %v2669_v39  }
 0x166   : > { %v1966_v16 = vadd.f32 %v1965_v7, %v1917_v12 }
 0x167   : > { %v1869_v26 = vpop.f32.mrf.mxu2 }
 0x168   : > { %v1870_v33 = vadd.f32 %v1869_v26, %v1821_v60  ;;  %v2002_v30 = vmax.f32 %v1966_v16, 0.0 }
 0x169   : > { %v1823_v0 = vpop.f32.mrf.mxu1 }
 0x16a   : > { %v1824_v31 = vadd.f32 %v1823_v0, %v3319_v59  ;;  %v2031_v57 = vsel %vm2019_vm2, %v2002_v30, 0.0 }
 0x16b   : > { %v1918_v20 = vpop.f32.mrf.mxu3 }
 0x16c   : > { %v1967_v18 = vpop.f32.mrf.mxu0  ;;  %v1919_v9 = vadd.f32 %v1918_v20, %v1870_v33 }
 0x16e   : > { %v1968_v34 = vadd.f32 %v1967_v18, %v1919_v9 }
 0x16f   : > { %v1872_v58 = vpop.f32.mrf.mxu2 }
 0x170   : > { %v2003_v14 = vmax.f32 %v1968_v34, 0.0  ;;  %v1873_v52 = vadd.f32 %v1872_v58, %v1824_v31 }
 0x171   : > { %v1825_v27 = vpop.f32.mrf.mxu1 }
 0x172   : > { %v2032_v11 = vsel %vm2022_vm3, %v2003_v14, 0.0  ;;  %v1826_v40 = vadd.f32 %v1825_v27, %v3325_v15 }
 0x173   : > { %v2674_v36 = vpack.c.bf16 %v2032_v11, %v2031_v57  ;;  %v1921_v41 = vpop.f32.mrf.mxu3 }
 0x174   : > { %v1970_v2 = vpop.f32.mrf.mxu0  ;;  %v1922_v37 = vadd.f32 %v1921_v41, %v1873_v52 }
 0x175   : > { %2717 = vst [vmem:[%s3395_s27 + $0x8] sm:$0xff] %v2674_v36  }
 0x176   : > { %v1971_v63 = vadd.f32 %v1970_v2, %v1922_v37 }
 0x177   : > { %v1874_v23 = vpop.f32.mrf.mxu2 }
 0x178   : > { %v1875_v32 = vadd.f32 %v1874_v23, %v1826_v40  ;;  %v2004_v61 = vmax.f32 %v1971_v63, 0.0 }
 0x179   : > { %v1828_v6 = vpop.f32.mrf.mxu1 }
 0x17a   : > { %v1829_v55 = vadd.f32 %v1828_v6, %v3329_v48  ;;  %v2033_v5 = vsel %vm2019_vm2, %v2004_v61, 0.0 }
 0x17b   : > { %v1923_v44 = vpop.f32.mrf.mxu3 }
 0x17c   : > { %v1972_v59 = vpop.f32.mrf.mxu0  ;;  %v1924_v46 = vadd.f32 %v1923_v44, %v1875_v32 }
 0x17e   : > { %v1973_v49 = vadd.f32 %v1972_v59, %v1924_v46 }
 0x17f   : > { %v1877_v53 = vpop.f32.mrf.mxu2 }
 0x180   : > { %v2005_v29 = vmax.f32 %v1973_v49, 0.0  ;;  %v1878_v25 = vadd.f32 %v1877_v53, %v1829_v55 }
 0x181   : > { %v1830_v56 = vpop.f32.mrf.mxu1 }
 0x182   : > { %v2034_v15 = vsel %vm2022_vm3, %v2005_v29, 0.0  ;;  %v1831_v62 = vadd.f32 %v1830_v56, %v3334_v19 }
 0x183   : > { %v2679_v17 = vpack.c.bf16 %v2034_v15, %v2033_v5  ;;  %v1926_v13 = vpop.f32.mrf.mxu3 }
 0x184   : > { %v1975_v47 = vpop.f32.mrf.mxu0  ;;  %v1927_v43 = vadd.f32 %v1926_v13, %v1878_v25 }
 0x185   : > { %2718 = vst [vmem:[%s3395_s27 + $0x10] sm:$0xff] %v2679_v17  }
 0x186   : > { %v1976_v28 = vadd.f32 %v1975_v47, %v1927_v43 }
 0x187   : > { %v1879_v45 = vpop.f32.mrf.mxu2 }
 0x188   : > { %v1880_v4 = vadd.f32 %v1879_v45, %v1831_v62  ;;  %v2006_v39 = vmax.f32 %v1976_v28, 0.0 }
 0x189   : > { %v1833_v1 = vpop.f32.mrf.mxu1 }
 0x18a   : > { %v1834_v0 = vadd.f32 %v1833_v1, %v3339_v50  ;;  %v2035_v33 = vsel %vm2019_vm2, %v2006_v39, 0.0 }
 0x18b   : > { %v1928_v7 = vpop.f32.mrf.mxu3 }
 0x18c   : > { %v1977_v48 = vpop.f32.mrf.mxu0  ;;  %v1929_v10 = vadd.f32 %v1928_v7, %v1880_v4 }
 0x18e   : > { %v1978_v8 = vadd.f32 %v1977_v48, %v1929_v10 }
 0x18f   : > { %v1882_v12 = vpop.f32.mrf.mxu2 }
 0x190   : > { %v2007_v26 = vmax.f32 %v1978_v8, 0.0  ;;  %v1883_v18 = vadd.f32 %v1882_v12, %v1834_v0 }
 0x191   : > { %v1835_v60 = vpop.f32.mrf.mxu1 }
 0x192   : > { %v2036_v19 = vsel %vm2022_vm3, %v2007_v26, 0.0  ;;  %v1836_v34 = vadd.f32 %v1835_v60, %v3345_v24 }
 0x193   : > { %v2684_v20 = vpack.c.bf16 %v2036_v19, %v2035_v33  ;;  %v1931_v9 = vpop.f32.mrf.mxu3 }
 0x194   : > { %v1980_v16 = vpop.f32.mrf.mxu0  ;;  %v1932_v30 = vadd.f32 %v1931_v9, %v1883_v18 }
 0x195   : > { %2719 = vst [vmem:[%s3395_s27 + $0x18] sm:$0xff] %v2684_v20  }
 0x196   : > { %v1981_v31 = vadd.f32 %v1980_v16, %v1932_v30 }
 0x197   : > { %v1884_v58 = vpop.f32.mrf.mxu2 }
 0x198   : > { %v1885_v14 = vadd.f32 %v1884_v58, %v1836_v34  ;;  %v2008_v2 = vmax.f32 %v1981_v31, 0.0 }
 0x199   : > { %v1838_v27 = vpop.f32.mrf.mxu1 }
 0x19a   : > { %v1839_v40 = vadd.f32 %v1838_v27, %v3352_v35  ;;  %v2037_v23 = vsel %vm2019_vm2, %v2008_v2, 0.0 }
 0x19b   : > { %v1933_v57 = vpop.f32.mrf.mxu3 }
 0x19c   : > { %v1982_v50 = vpop.f32.mrf.mxu0  ;;  %v1934_v11 = vadd.f32 %v1933_v57, %v1885_v14 }
 0x19e   : > { %v1983_v52 = vadd.f32 %v1982_v50, %v1934_v11 }
 0x19f   : > { %v1887_v36 = vpop.f32.mrf.mxu2 }
 0x1a0   : > { %v2009_v37 = vmax.f32 %v1983_v52, 0.0  ;;  %v1888_v32 = vadd.f32 %v1887_v36, %v1839_v40 }
 0x1a1   : > { %v1840_v41 = vpop.f32.mrf.mxu1 }
 0x1a2   : > { %v2038_v24 = vsel %vm2022_vm3, %v2009_v37, 0.0  ;;  %v1841_v46 = vadd.f32 %v1840_v41, %v3359_v54 }
 0x1a3   : > { %v2689_v63 = vpack.c.bf16 %v2038_v24, %v2037_v23  ;;  %v1936_v59 = vpop.f32.mrf.mxu3 }
 0x1a4   : > { %v1985_v6 = vpop.f32.mrf.mxu0  ;;  %v1937_v44 = vadd.f32 %v1936_v59, %v1888_v32 }
 0x1a5   : > { %2720 = vst [vmem:[%s3395_s27 + $0x20] sm:$0xff] %v2689_v63  }
 0x1a6   : > { %v1986_v56 = vadd.f32 %v1985_v6, %v1937_v44 }
 0x1a7   : > { %v1889_v61 = vpop.f32.mrf.mxu2 }
 0x1a8   : > { %v1890_v53 = vadd.f32 %v1889_v61, %v1841_v46  ;;  %v2010_v5 = vmax.f32 %v1986_v56, 0.0 }
 0x1a9   : > { %v1843_v49 = vpop.f32.mrf.mxu1 }
 0x1aa   : > { %v1844_v13 = vadd.f32 %v1843_v49, %v3365_v3  ;;  %v2039_v43 = vsel %vm2019_vm2, %v2010_v5, 0.0 }
 0x1ab   : > { %v1938_v29 = vpop.f32.mrf.mxu3 }
 0x1ac   : > { %v1987_v35 = vpop.f32.mrf.mxu0  ;;  %v1939_v55 = vadd.f32 %v1938_v29, %v1890_v53 }
 0x1ae   : > { %v1988_v15 = vadd.f32 %v1987_v35, %v1939_v55 }
 0x1af   : > { %v1892_v47 = vpop.f32.mrf.mxu2 }
 0x1b0   : > { %v2011_v17 = vmax.f32 %v1988_v15, 0.0  ;;  %v1893_v45 = vadd.f32 %v1892_v47, %v1844_v13 }
 0x1b1   : > { %v1845_v25 = vpop.f32.mrf.mxu1 }
 0x1b2   : > { %v2040_v54 = vsel %vm2022_vm3, %v2011_v17, 0.0  ;;  %v1846_v48 = vadd.f32 %v1845_v25, %v3371_v42 }
 0x1b3   : > { %v2694_v1 = vpack.c.bf16 %v2040_v54, %v2039_v43  ;;  %v1941_v4 = vpop.f32.mrf.mxu3 }
 0x1b4   : > { %v1990_v62 = vpop.f32.mrf.mxu0  ;;  %v1942_v28 = vadd.f32 %v1941_v4, %v1893_v45 }
 0x1b5   : > { %2721 = vst [vmem:[%s3395_s27 + $0x28] sm:$0xff] %v2694_v1  }
 0x1b6   : > { %v1991_v8 = vadd.f32 %v1990_v62, %v1942_v28 }
 0x1b7   : > { %v1894_v7 = vpop.f32.mrf.mxu2 }
 0x1b8   : > { %v1895_v10 = vadd.f32 %v1894_v7, %v1846_v48  ;;  %v2012_v26 = vmax.f32 %v1991_v8, 0.0 }
 0x1b9   : > { %v1848_v39 = vpop.f32.mrf.mxu1 }
 0x1ba   : > { %v1849_v16 = vadd.f32 %v1848_v39, %v3375_v51  ;;  %v2041_v18 = vsel %vm2019_vm2, %v2012_v26, 0.0 }
 0x1bb   : > { %v1943_v12 = vpop.f32.mrf.mxu3 }
 0x1bc   : > { %v1992_v3 = vpop.f32.mrf.mxu0  ;;  %v1944_v60 = vadd.f32 %v1943_v12, %v1895_v10 }
 0x1be   : > { %v1993_v0 = vadd.f32 %v1992_v3, %v1944_v60 }
 0x1bf   : > { %v1897_v33 = vpop.f32.mrf.mxu2 }
 0x1c0   : > { %v2013_v19 = vmax.f32 %v1993_v0, 0.0  ;;  %v1898_v20 = vadd.f32 %v1897_v33, %v1849_v16 }
 0x1c1   : > { %v1850_v9 = vpop.f32.mrf.mxu1 }
 0x1c2   : > { %v2042_v42 = vsel %vm2022_vm3, %v2013_v19, 0.0  ;;  %v1851_v14 = vadd.f32 %v1850_v9, %v3377_v38 }
 0x1c3   : > { %v2699_v30 = vpack.c.bf16 %v2042_v42, %v2041_v18  ;;  %v1946_v58 = vpop.f32.mrf.mxu3 }
 0x1c4   : > { %v1995_v34 = vpop.f32.mrf.mxu0  ;;  %v1947_v27 = vadd.f32 %v1946_v58, %v1898_v20 }
 0x1c5   : > { %2722 = vst [vmem:[%s3395_s27 + $0x30] sm:$0xff] %v2699_v30  }
 0x1c6   : > { %v1996_v57 = vadd.f32 %v1995_v34, %v1947_v27 }
 0x1c7   : > { %v1899_v31 = vpop.f32.mrf.mxu2 }
 0x1c8   : > { %v1900_v50 = vadd.f32 %v1899_v31, %v1851_v14  ;;  %v2014_v52 = vmax.f32 %v1996_v57, 0.0 }
 0x1ca   : > { %v2043_v37 = vsel %vm2019_vm2, %v2014_v52, 0.0 }
 0x1cb   : > { %v1948_v51 = vpop.f32.mrf.mxu3 }
 0x1cc   : > { %v1949_v11 = vadd.f32 %v1948_v51, %v1900_v50  ;;  %v1997_v2 = vpop.f32.mrf.mxu0 }
 0x1ce   : > { %v1998_v36 = vadd.f32 %v1997_v2, %v1949_v11 }
 0x1d0   : > { %v2015_v41 = vmax.f32 %v1998_v36, 0.0 }
 0x1d2   : > { %v2044_v40 = vsel %vm2022_vm3, %v2015_v41, 0.0 }
 0x1d3   : > { %v2704_v23 = vpack.c.bf16 %v2044_v40, %v2043_v37 }
 0x1d5   : > { %2723 = vst [vmem:[%s3395_s27 + $0x38] sm:$0xff] %v2704_v23  }
 0x1d6 PF: > { %s14_s17 = sadd.s32 1, %s2799_s17   ;;  %s3462_s15 = smov %s2795_s16 }
 0x1d7   : > { %p11_p5 = scmp.ge.s32.totalorder %s14_s17, 4   ;;  %s3463_s16 = smov %s3465_s18 }
 0x1d9   :  { %13 = sbr.rel (!%p11_p5) target bundleno = 2 (0x2), region = 69 }

</bundles_post_ra>
